<compile_context>
chip_gen: v7x
topology: tpu7x:2x2x1
jax: 0.10.0
libtpu: 0.0.40
codegen_flags: <defaults>
</compile_context>

<pallas_src>
import functools

import jax
import jax.numpy as jnp
from jax.experimental import pallas as pl
from jax.experimental.pallas import tpu as pltpu


def _quad_kernel(w_ref, x_ref, o_ref, *, pairs):
    """Per-pixel quadratic channel map on one (image, width-tile) block.

    w_ref: SMEM f32[C_out * n_pairs]; w_ref[o*n_pairs + p] is the symmetrized
           coefficient of the p-th (i<=j) channel pair for output channel o.
    x_ref: VMEM (C_in, H, tw) tile of the NCHW input.
    o_ref: VMEM (C_out, tw, H) tile of the (N, C_out, W, H) output (spatially
           transposed, fusing the module's (w,h)->(h,w) reinterpretation).
    """
    c_in = x_ref.shape[0]
    c_out, tw, th = o_ref.shape
    n_pairs = len(pairs)

    # Per-channel (H, tw) -> (tw, H) transpose (XLU; it has idle slots here).
    xt = [x_ref[c].astype(jnp.float32).T for c in range(c_in)]

    # Bilinear form evaluated directly on the VPU from SMEM scalars: nothing bigger
    # than one (tw, th) slab is ever materialized (no (C_in*C_out, pixels) P, no
    # MXU-result pops/stores -- the matmul would have K=C_in<=8 anyway).
    # TODO(synk): for large C_in/C_out switch this unrolled accumulation to a blocked
    # MXU form (per-j  W_j @ X  folded straight into the accumulator via fori_loop).
    acc = [jnp.zeros((tw, th), jnp.float32) for _ in range(c_out)]
    for p, (i, j) in enumerate(pairs):
        xx = xt[i] * xt[j]                                   # shared across outputs
        for o in range(c_out):
            acc[o] = acc[o] + w_ref[o * n_pairs + p] * xx    # scalar * slab (VPU)
    for o in range(c_out):
        o_ref[o] = acc[o].astype(o_ref.dtype)


def _choose_width_tile(H, W, target_pixels):
    # tw is a lane dim of the input block and a sublane dim of the output block, so it
    # must be a multiple of 128 or the full width W.  It always divides W exactly, so
    # there is never a ragged tile -> no wrapper-side pad / slice HBM passes.
    if H * W <= target_pixels or W % 128 != 0:
        return W
    tw = 128
    while tw * 2 <= W and W % (tw * 2) == 0 and H * (tw * 2) <= target_pixels:
        tw *= 2
    return tw


def conv2d_quadratic_forward(x, quadratic, *, target_tile_pixels=8192):
    """x: (N, C_in, H, W) NCHW; quadratic: (C_out, C_in*C_in). Returns (N, C_out, H, W)."""
    N, C_in, H, W = x.shape
    C_out = quadratic.shape[0]
    assert quadratic.shape == (C_out, C_in * C_in)

    tw = _choose_width_tile(H, W, target_tile_pixels)
    num_wt = W // tw                     # exact division by construction

    # Symmetrized coefficients (tiny host-side tensor):
    #   y[o] = sum_i q[o,i,i] x_i^2 + sum_{i<j} (q[o,i,j] + q[o,j,i]) x_i x_j
    pairs = tuple((i, j) for i in range(C_in) for j in range(i, C_in))
    wq = quadratic.astype(jnp.float32).reshape(C_out, C_in, C_in)
    cols = [wq[:, i, j] if i == j else wq[:, i, j] + wq[:, j, i] for (i, j) in pairs]
    wcoef = jnp.stack(cols, axis=1).reshape(-1)      # f32[C_out * n_pairs], [o*n_pairs + p]

    # VMEM budget from the actual footprint: double-buffered in/out tiles plus the
    # in-kernel f32 live slabs, floored at 8 MiB and capped at 32 MiB (v7x-safe).
    in_tile = C_in * H * tw * x.dtype.itemsize
    out_tile = C_out * tw * H * x.dtype.itemsize
    live = (C_in + C_out + 2) * tw * H * 4
    vmem_limit = int(min(32 * 1024 * 1024,
                         max(8 * 1024 * 1024, 2 * (in_tile + out_tile) + 2 * live)))

    kernel = functools.partial(_quad_kernel, pairs=pairs)

    out_wh = pl.pallas_call(
        kernel,
        out_shape=jax.ShapeDtypeStruct((N, C_out, W, H), x.dtype),
        grid_spec=pltpu.PrefetchScalarGridSpec(
            num_scalar_prefetch=0,
            # N >= 2 (or several width tiles) -> >=2 grid steps for v7x's two TCs.
            grid=(N, num_wt),
            in_specs=[
                # Tiny coefficient table, resident in SMEM (scalar reads in-kernel).
                pl.BlockSpec(memory_space=pltpu.MemorySpace.SMEM),
                # (C_in, H, tw) NCHW tile of image n; no input transpose in the wrapper.
                pl.BlockSpec((None, C_in, H, tw), lambda n, t: (n, 0, 0, t)),
            ],
            # Spatially transposed tile of the (N, C_out, W, H) output buffer.
            out_specs=pl.BlockSpec((None, C_out, tw, H), lambda n, t: (n, 0, t, 0)),
        ),
        compiler_params=pltpu.CompilerParams(
            dimension_semantics=("parallel", "parallel"),
            vmem_limit_bytes=vmem_limit,
        ),
    )(wcoef, x)

    # (N, C_out, W, H) -> (N, C_out, H, W): a pure reinterpretation of the flat spatial
    # axis.  This reproduces exactly the module's reshape of (n,w,h)-ordered rows as
    # (n,h,w) followed by the two transposes -- no extra HBM pass.
    return out_wh.reshape(N, C_out, H, W)


def _reference_forward(x, quadratic):
    """Pure-JAX literal transcription of the PyTorch forward, for verification."""
    N, C_in, H, W = x.shape
    C_out = quadratic.shape[0]
    xf = jnp.transpose(x, (0, 3, 2, 1)).reshape(-1, C_in)
    qin = (xf[:, :, None] * xf[:, None, :]).reshape(-1, C_in * C_in)
    y = qin @ quadratic.T
    y = y.reshape(N, H, W, C_out)
    y = jnp.swapaxes(y, 1, 3)   # .transpose(1, 3)
    y = jnp.swapaxes(y, 2, 3)   # .transpose(2, 3)
    return y


if __name__ == "__main__":
    # Small shapes consistent with the module: NCHW input, quadratic (C_out, C_in^2).
    N, C_in, H, W = 2, 4, 16, 16
    C_out = 8

    key = jax.random.PRNGKey(0)
    kx, kq = jax.random.split(key)
    x = jax.random.normal(kx, (N, C_in, H, W), dtype=jnp.float32)
    # NOTE: the module's reset_parameters() uses init.normal_(std=0) (all zeros);
    # we use a deterministic nonzero weight so the kernel does real work.
    quadratic = 0.1 * jax.random.normal(kq, (C_out, C_in * C_in), dtype=jnp.float32)

    y = conv2d_quadratic_forward(x, quadratic)
    y = jax.block_until_ready(y)

    y_ref = _reference_forward(x, quadratic)
    assert y.shape == (N, C_out, H, W), y.shape
    assert jnp.allclose(y, y_ref, atol=1e-5, rtol=1e-5), "mismatch vs reference"

    print("KERNEL_OK")
</pallas_src>

<mosaic_0001>
module attributes {stable_mosaic.version = 11 : i64} {
  func.func @_quad_kernel(%arg0: i32, %arg1: i32, %arg2: memref<80xf32, #tpu.memory_space<smem>>, %arg3: memref<1x4x16x16xf32, #tpu.memory_space<vmem>>, %arg4: memref<1x8x16x16xf32, #tpu.memory_space<vmem>>) attributes {dimension_semantics = [#tpu.dimension_semantics<parallel>, #tpu.dimension_semantics<parallel>], iteration_bounds = array<i64: 2, 1>, scalar_prefetch = 0 : i64, scratch_operands = 0 : i64, tpu.core_type = #tpu.core_type<tc>, window_params = [{transform_indices = @transform_0, window_bounds = array<i64: 80>}, {transform_indices = @transform_1, window_bounds = array<i64: 1, 4, 16, 16>}, {transform_indices = @transform_2, window_bounds = array<i64: 1, 8, 16, 16>}]} {
    %c0 = arith.constant 0 : index
    %c0_0 = arith.constant 0 : index
    %c0_1 = arith.constant 0 : index
    %c0_2 = arith.constant 0 : index
    %0 = vector.load %arg3[%c0, %c0_0, %c0_1, %c0_2] : memref<1x4x16x16xf32, #tpu.memory_space<vmem>>, vector<1x1x16x16xf32>
    %1 = vector.shape_cast %0 : vector<1x1x16x16xf32> to vector<16x16xf32>
    %2 = tpu.transpose %1, [1, 0] : vector<16x16xf32> -> vector<16x16xf32>
    %c0_3 = arith.constant 0 : index
    %c1 = arith.constant 1 : index
    %c0_4 = arith.constant 0 : index
    %c0_5 = arith.constant 0 : index
    %3 = vector.load %arg3[%c0_3, %c1, %c0_4, %c0_5] : memref<1x4x16x16xf32, #tpu.memory_space<vmem>>, vector<1x1x16x16xf32>
    %4 = vector.shape_cast %3 : vector<1x1x16x16xf32> to vector<16x16xf32>
    %5 = tpu.transpose %4, [1, 0] : vector<16x16xf32> -> vector<16x16xf32>
    %c0_6 = arith.constant 0 : index
    %c2 = arith.constant 2 : index
    %c0_7 = arith.constant 0 : index
    %c0_8 = arith.constant 0 : index
    %6 = vector.load %arg3[%c0_6, %c2, %c0_7, %c0_8] : memref<1x4x16x16xf32, #tpu.memory_space<vmem>>, vector<1x1x16x16xf32>
    %7 = vector.shape_cast %6 : vector<1x1x16x16xf32> to vector<16x16xf32>
    %8 = tpu.transpose %7, [1, 0] : vector<16x16xf32> -> vector<16x16xf32>
    %c0_9 = arith.constant 0 : index
    %c3 = arith.constant 3 : index
    %c0_10 = arith.constant 0 : index
    %c0_11 = arith.constant 0 : index
    %9 = vector.load %arg3[%c0_9, %c3, %c0_10, %c0_11] : memref<1x4x16x16xf32, #tpu.memory_space<vmem>>, vector<1x1x16x16xf32>
    %10 = vector.shape_cast %9 : vector<1x1x16x16xf32> to vector<16x16xf32>
    %11 = tpu.transpose %10, [1, 0] : vector<16x16xf32> -> vector<16x16xf32>
    %cst = arith.constant 0.000000e+00 : f32
    %12 = vector.broadcast %cst : f32 to vector<16x16xf32>
    %cst_12 = arith.constant 0.000000e+00 : f32
    %13 = vector.broadcast %cst_12 : f32 to vector<16x16xf32>
    %cst_13 = arith.constant 0.000000e+00 : f32
    %14 = vector.broadcast %cst_13 : f32 to vector<16x16xf32>
    %cst_14 = arith.constant 0.000000e+00 : f32
    %15 = vector.broadcast %cst_14 : f32 to vector<16x16xf32>
    %cst_15 = arith.constant 0.000000e+00 : f32
    %16 = vector.broadcast %cst_15 : f32 to vector<16x16xf32>
    %cst_16 = arith.constant 0.000000e+00 : f32
    %17 = vector.broadcast %cst_16 : f32 to vector<16x16xf32>
    %cst_17 = arith.constant 0.000000e+00 : f32
    %18 = vector.broadcast %cst_17 : f32 to vector<16x16xf32>
    %cst_18 = arith.constant 0.000000e+00 : f32
    %19 = vector.broadcast %cst_18 : f32 to vector<16x16xf32>
    %20 = arith.mulf %2, %2 : vector<16x16xf32>
    %c0_19 = arith.constant 0 : index
    %21 = memref.load %arg2[%c0_19] : memref<80xf32, #tpu.memory_space<smem>>
    %22 = vector.broadcast %21 : f32 to vector<16x16xf32>
    %23 = arith.mulf %22, %20 : vector<16x16xf32>
    %24 = arith.addf %12, %23 : vector<16x16xf32>
    %c10 = arith.constant 10 : index
    %25 = memref.load %arg2[%c10] : memref<80xf32, #tpu.memory_space<smem>>
    %26 = vector.broadcast %25 : f32 to vector<16x16xf32>
    %27 = arith.mulf %26, %20 : vector<16x16xf32>
    %28 = arith.addf %13, %27 : vector<16x16xf32>
    %c20 = arith.constant 20 : index
    %29 = memref.load %arg2[%c20] : memref<80xf32, #tpu.memory_space<smem>>
    %30 = vector.broadcast %29 : f32 to vector<16x16xf32>
    %31 = arith.mulf %30, %20 : vector<16x16xf32>
    %32 = arith.addf %14, %31 : vector<16x16xf32>
    %c30 = arith.constant 30 : index
    %33 = memref.load %arg2[%c30] : memref<80xf32, #tpu.memory_space<smem>>
    %34 = vector.broadcast %33 : f32 to vector<16x16xf32>
    %35 = arith.mulf %34, %20 : vector<16x16xf32>
    %36 = arith.addf %15, %35 : vector<16x16xf32>
    %c40 = arith.constant 40 : index
    %37 = memref.load %arg2[%c40] : memref<80xf32, #tpu.memory_space<smem>>
    %38 = vector.broadcast %37 : f32 to vector<16x16xf32>
    %39 = arith.mulf %38, %20 : vector<16x16xf32>
    %40 = arith.addf %16, %39 : vector<16x16xf32>
    %c50 = arith.constant 50 : index
    %41 = memref.load %arg2[%c50] : memref<80xf32, #tpu.memory_space<smem>>
    %42 = vector.broadcast %41 : f32 to vector<16x16xf32>
    %43 = arith.mulf %42, %20 : vector<16x16xf32>
    %44 = arith.addf %17, %43 : vector<16x16xf32>
    %c60 = arith.constant 60 : index
    %45 = memref.load %arg2[%c60] : memref<80xf32, #tpu.memory_space<smem>>
    %46 = vector.broadcast %45 : f32 to vector<16x16xf32>
    %47 = arith.mulf %46, %20 : vector<16x16xf32>
    %48 = arith.addf %18, %47 : vector<16x16xf32>
    %c70 = arith.constant 70 : index
    %49 = memref.load %arg2[%c70] : memref<80xf32, #tpu.memory_space<smem>>
    %50 = vector.broadcast %49 : f32 to vector<16x16xf32>
    %51 = arith.mulf %50, %20 : vector<16x16xf32>
    %52 = arith.addf %19, %51 : vector<16x16xf32>
    %53 = arith.mulf %2, %5 : vector<16x16xf32>
    %c1_20 = arith.constant 1 : index
    %54 = memref.load %arg2[%c1_20] : memref<80xf32, #tpu.memory_space<smem>>
    %55 = vector.broadcast %54 : f32 to vector<16x16xf32>
    %56 = arith.mulf %55, %53 : vector<16x16xf32>
    %57 = arith.addf %24, %56 : vector<16x16xf32>
    %c11 = arith.constant 11 : index
    %58 = memref.load %arg2[%c11] : memref<80xf32, #tpu.memory_space<smem>>
    %59 = vector.broadcast %58 : f32 to vector<16x16xf32>
    %60 = arith.mulf %59, %53 : vector<16x16xf32>
    %61 = arith.addf %28, %60 : vector<16x16xf32>
    %c21 = arith.constant 21 : index
    %62 = memref.load %arg2[%c21] : memref<80xf32, #tpu.memory_space<smem>>
    %63 = vector.broadcast %62 : f32 to vector<16x16xf32>
    %64 = arith.mulf %63, %53 : vector<16x16xf32>
    %65 = arith.addf %32, %64 : vector<16x16xf32>
    %c31 = arith.constant 31 : index
    %66 = memref.load %arg2[%c31] : memref<80xf32, #tpu.memory_space<smem>>
    %67 = vector.broadcast %66 : f32 to vector<16x16xf32>
    %68 = arith.mulf %67, %53 : vector<16x16xf32>
    %69 = arith.addf %36, %68 : vector<16x16xf32>
    %c41 = arith.constant 41 : index
    %70 = memref.load %arg2[%c41] : memref<80xf32, #tpu.memory_space<smem>>
    %71 = vector.broadcast %70 : f32 to vector<16x16xf32>
    %72 = arith.mulf %71, %53 : vector<16x16xf32>
    %73 = arith.addf %40, %72 : vector<16x16xf32>
    %c51 = arith.constant 51 : index
    %74 = memref.load %arg2[%c51] : memref<80xf32, #tpu.memory_space<smem>>
    %75 = vector.broadcast %74 : f32 to vector<16x16xf32>
    %76 = arith.mulf %75, %53 : vector<16x16xf32>
    %77 = arith.addf %44, %76 : vector<16x16xf32>
    %c61 = arith.constant 61 : index
    %78 = memref.load %arg2[%c61] : memref<80xf32, #tpu.memory_space<smem>>
    %79 = vector.broadcast %78 : f32 to vector<16x16xf32>
    %80 = arith.mulf %79, %53 : vector<16x16xf32>
    %81 = arith.addf %48, %80 : vector<16x16xf32>
    %c71 = arith.constant 71 : index
    %82 = memref.load %arg2[%c71] : memref<80xf32, #tpu.memory_space<smem>>
    %83 = vector.broadcast %82 : f32 to vector<16x16xf32>
    %84 = arith.mulf %83, %53 : vector<16x16xf32>
    %85 = arith.addf %52, %84 : vector<16x16xf32>
    %86 = arith.mulf %2, %8 : vector<16x16xf32>
    %c2_21 = arith.constant 2 : index
    %87 = memref.load %arg2[%c2_21] : memref<80xf32, #tpu.memory_space<smem>>
    %88 = vector.broadcast %87 : f32 to vector<16x16xf32>
    %89 = arith.mulf %88, %86 : vector<16x16xf32>
    %90 = arith.addf %57, %89 : vector<16x16xf32>
    %c12 = arith.constant 12 : index
    %91 = memref.load %arg2[%c12] : memref<80xf32, #tpu.memory_space<smem>>
    %92 = vector.broadcast %91 : f32 to vector<16x16xf32>
    %93 = arith.mulf %92, %86 : vector<16x16xf32>
    %94 = arith.addf %61, %93 : vector<16x16xf32>
    %c22 = arith.constant 22 : index
    %95 = memref.load %arg2[%c22] : memref<80xf32, #tpu.memory_space<smem>>
    %96 = vector.broadcast %95 : f32 to vector<16x16xf32>
    %97 = arith.mulf %96, %86 : vector<16x16xf32>
    %98 = arith.addf %65, %97 : vector<16x16xf32>
    %c32 = arith.constant 32 : index
    %99 = memref.load %arg2[%c32] : memref<80xf32, #tpu.memory_space<smem>>
    %100 = vector.broadcast %99 : f32 to vector<16x16xf32>
    %101 = arith.mulf %100, %86 : vector<16x16xf32>
    %102 = arith.addf %69, %101 : vector<16x16xf32>
    %c42 = arith.constant 42 : index
    %103 = memref.load %arg2[%c42] : memref<80xf32, #tpu.memory_space<smem>>
    %104 = vector.broadcast %103 : f32 to vector<16x16xf32>
    %105 = arith.mulf %104, %86 : vector<16x16xf32>
    %106 = arith.addf %73, %105 : vector<16x16xf32>
    %c52 = arith.constant 52 : index
    %107 = memref.load %arg2[%c52] : memref<80xf32, #tpu.memory_space<smem>>
    %108 = vector.broadcast %107 : f32 to vector<16x16xf32>
    %109 = arith.mulf %108, %86 : vector<16x16xf32>
    %110 = arith.addf %77, %109 : vector<16x16xf32>
    %c62 = arith.constant 62 : index
    %111 = memref.load %arg2[%c62] : memref<80xf32, #tpu.memory_space<smem>>
    %112 = vector.broadcast %111 : f32 to vector<16x16xf32>
    %113 = arith.mulf %112, %86 : vector<16x16xf32>
    %114 = arith.addf %81, %113 : vector<16x16xf32>
    %c72 = arith.constant 72 : index
    %115 = memref.load %arg2[%c72] : memref<80xf32, #tpu.memory_space<smem>>
    %116 = vector.broadcast %115 : f32 to vector<16x16xf32>
    %117 = arith.mulf %116, %86 : vector<16x16xf32>
    %118 = arith.addf %85, %117 : vector<16x16xf32>
    %119 = arith.mulf %2, %11 : vector<16x16xf32>
    %c3_22 = arith.constant 3 : index
    %120 = memref.load %arg2[%c3_22] : memref<80xf32, #tpu.memory_space<smem>>
    %121 = vector.broadcast %120 : f32 to vector<16x16xf32>
    %122 = arith.mulf %121, %119 : vector<16x16xf32>
    %123 = arith.addf %90, %122 : vector<16x16xf32>
    %c13 = arith.constant 13 : index
    %124 = memref.load %arg2[%c13] : memref<80xf32, #tpu.memory_space<smem>>
    %125 = vector.broadcast %124 : f32 to vector<16x16xf32>
    %126 = arith.mulf %125, %119 : vector<16x16xf32>
    %127 = arith.addf %94, %126 : vector<16x16xf32>
    %c23 = arith.constant 23 : index
    %128 = memref.load %arg2[%c23] : memref<80xf32, #tpu.memory_space<smem>>
    %129 = vector.broadcast %128 : f32 to vector<16x16xf32>
    %130 = arith.mulf %129, %119 : vector<16x16xf32>
    %131 = arith.addf %98, %130 : vector<16x16xf32>
    %c33 = arith.constant 33 : index
    %132 = memref.load %arg2[%c33] : memref<80xf32, #tpu.memory_space<smem>>
    %133 = vector.broadcast %132 : f32 to vector<16x16xf32>
    %134 = arith.mulf %133, %119 : vector<16x16xf32>
    %135 = arith.addf %102, %134 : vector<16x16xf32>
    %c43 = arith.constant 43 : index
    %136 = memref.load %arg2[%c43] : memref<80xf32, #tpu.memory_space<smem>>
    %137 = vector.broadcast %136 : f32 to vector<16x16xf32>
    %138 = arith.mulf %137, %119 : vector<16x16xf32>
    %139 = arith.addf %106, %138 : vector<16x16xf32>
    %c53 = arith.constant 53 : index
    %140 = memref.load %arg2[%c53] : memref<80xf32, #tpu.memory_space<smem>>
    %141 = vector.broadcast %140 : f32 to vector<16x16xf32>
    %142 = arith.mulf %141, %119 : vector<16x16xf32>
    %143 = arith.addf %110, %142 : vector<16x16xf32>
    %c63 = arith.constant 63 : index
    %144 = memref.load %arg2[%c63] : memref<80xf32, #tpu.memory_space<smem>>
    %145 = vector.broadcast %144 : f32 to vector<16x16xf32>
    %146 = arith.mulf %145, %119 : vector<16x16xf32>
    %147 = arith.addf %114, %146 : vector<16x16xf32>
    %c73 = arith.constant 73 : index
    %148 = memref.load %arg2[%c73] : memref<80xf32, #tpu.memory_space<smem>>
    %149 = vector.broadcast %148 : f32 to vector<16x16xf32>
    %150 = arith.mulf %149, %119 : vector<16x16xf32>
    %151 = arith.addf %118, %150 : vector<16x16xf32>
    %152 = arith.mulf %5, %5 : vector<16x16xf32>
    %c4 = arith.constant 4 : index
    %153 = memref.load %arg2[%c4] : memref<80xf32, #tpu.memory_space<smem>>
    %154 = vector.broadcast %153 : f32 to vector<16x16xf32>
    %155 = arith.mulf %154, %152 : vector<16x16xf32>
    %156 = arith.addf %123, %155 : vector<16x16xf32>
    %c14 = arith.constant 14 : index
    %157 = memref.load %arg2[%c14] : memref<80xf32, #tpu.memory_space<smem>>
    %158 = vector.broadcast %157 : f32 to vector<16x16xf32>
    %159 = arith.mulf %158, %152 : vector<16x16xf32>
    %160 = arith.addf %127, %159 : vector<16x16xf32>
    %c24 = arith.constant 24 : index
    %161 = memref.load %arg2[%c24] : memref<80xf32, #tpu.memory_space<smem>>
    %162 = vector.broadcast %161 : f32 to vector<16x16xf32>
    %163 = arith.mulf %162, %152 : vector<16x16xf32>
    %164 = arith.addf %131, %163 : vector<16x16xf32>
    %c34 = arith.constant 34 : index
    %165 = memref.load %arg2[%c34] : memref<80xf32, #tpu.memory_space<smem>>
    %166 = vector.broadcast %165 : f32 to vector<16x16xf32>
    %167 = arith.mulf %166, %152 : vector<16x16xf32>
    %168 = arith.addf %135, %167 : vector<16x16xf32>
    %c44 = arith.constant 44 : index
    %169 = memref.load %arg2[%c44] : memref<80xf32, #tpu.memory_space<smem>>
    %170 = vector.broadcast %169 : f32 to vector<16x16xf32>
    %171 = arith.mulf %170, %152 : vector<16x16xf32>
    %172 = arith.addf %139, %171 : vector<16x16xf32>
    %c54 = arith.constant 54 : index
    %173 = memref.load %arg2[%c54] : memref<80xf32, #tpu.memory_space<smem>>
    %174 = vector.broadcast %173 : f32 to vector<16x16xf32>
    %175 = arith.mulf %174, %152 : vector<16x16xf32>
    %176 = arith.addf %143, %175 : vector<16x16xf32>
    %c64 = arith.constant 64 : index
    %177 = memref.load %arg2[%c64] : memref<80xf32, #tpu.memory_space<smem>>
    %178 = vector.broadcast %177 : f32 to vector<16x16xf32>
    %179 = arith.mulf %178, %152 : vector<16x16xf32>
    %180 = arith.addf %147, %179 : vector<16x16xf32>
    %c74 = arith.constant 74 : index
    %181 = memref.load %arg2[%c74] : memref<80xf32, #tpu.memory_space<smem>>
    %182 = vector.broadcast %181 : f32 to vector<16x16xf32>
    %183 = arith.mulf %182, %152 : vector<16x16xf32>
    %184 = arith.addf %151, %183 : vector<16x16xf32>
    %185 = arith.mulf %5, %8 : vector<16x16xf32>
    %c5 = arith.constant 5 : index
    %186 = memref.load %arg2[%c5] : memref<80xf32, #tpu.memory_space<smem>>
    %187 = vector.broadcast %186 : f32 to vector<16x16xf32>
    %188 = arith.mulf %187, %185 : vector<16x16xf32>
    %189 = arith.addf %156, %188 : vector<16x16xf32>
    %c15 = arith.constant 15 : index
    %190 = memref.load %arg2[%c15] : memref<80xf32, #tpu.memory_space<smem>>
    %191 = vector.broadcast %190 : f32 to vector<16x16xf32>
    %192 = arith.mulf %191, %185 : vector<16x16xf32>
    %193 = arith.addf %160, %192 : vector<16x16xf32>
    %c25 = arith.constant 25 : index
    %194 = memref.load %arg2[%c25] : memref<80xf32, #tpu.memory_space<smem>>
    %195 = vector.broadcast %194 : f32 to vector<16x16xf32>
    %196 = arith.mulf %195, %185 : vector<16x16xf32>
    %197 = arith.addf %164, %196 : vector<16x16xf32>
    %c35 = arith.constant 35 : index
    %198 = memref.load %arg2[%c35] : memref<80xf32, #tpu.memory_space<smem>>
    %199 = vector.broadcast %198 : f32 to vector<16x16xf32>
    %200 = arith.mulf %199, %185 : vector<16x16xf32>
    %201 = arith.addf %168, %200 : vector<16x16xf32>
    %c45 = arith.constant 45 : index
    %202 = memref.load %arg2[%c45] : memref<80xf32, #tpu.memory_space<smem>>
    %203 = vector.broadcast %202 : f32 to vector<16x16xf32>
    %204 = arith.mulf %203, %185 : vector<16x16xf32>
    %205 = arith.addf %172, %204 : vector<16x16xf32>
    %c55 = arith.constant 55 : index
    %206 = memref.load %arg2[%c55] : memref<80xf32, #tpu.memory_space<smem>>
    %207 = vector.broadcast %206 : f32 to vector<16x16xf32>
    %208 = arith.mulf %207, %185 : vector<16x16xf32>
    %209 = arith.addf %176, %208 : vector<16x16xf32>
    %c65 = arith.constant 65 : index
    %210 = memref.load %arg2[%c65] : memref<80xf32, #tpu.memory_space<smem>>
    %211 = vector.broadcast %210 : f32 to vector<16x16xf32>
    %212 = arith.mulf %211, %185 : vector<16x16xf32>
    %213 = arith.addf %180, %212 : vector<16x16xf32>
    %c75 = arith.constant 75 : index
    %214 = memref.load %arg2[%c75] : memref<80xf32, #tpu.memory_space<smem>>
    %215 = vector.broadcast %214 : f32 to vector<16x16xf32>
    %216 = arith.mulf %215, %185 : vector<16x16xf32>
    %217 = arith.addf %184, %216 : vector<16x16xf32>
    %218 = arith.mulf %5, %11 : vector<16x16xf32>
    %c6 = arith.constant 6 : index
    %219 = memref.load %arg2[%c6] : memref<80xf32, #tpu.memory_space<smem>>
    %220 = vector.broadcast %219 : f32 to vector<16x16xf32>
    %221 = arith.mulf %220, %218 : vector<16x16xf32>
    %222 = arith.addf %189, %221 : vector<16x16xf32>
    %c16 = arith.constant 16 : index
    %223 = memref.load %arg2[%c16] : memref<80xf32, #tpu.memory_space<smem>>
    %224 = vector.broadcast %223 : f32 to vector<16x16xf32>
    %225 = arith.mulf %224, %218 : vector<16x16xf32>
    %226 = arith.addf %193, %225 : vector<16x16xf32>
    %c26 = arith.constant 26 : index
    %227 = memref.load %arg2[%c26] : memref<80xf32, #tpu.memory_space<smem>>
    %228 = vector.broadcast %227 : f32 to vector<16x16xf32>
    %229 = arith.mulf %228, %218 : vector<16x16xf32>
    %230 = arith.addf %197, %229 : vector<16x16xf32>
    %c36 = arith.constant 36 : index
    %231 = memref.load %arg2[%c36] : memref<80xf32, #tpu.memory_space<smem>>
    %232 = vector.broadcast %231 : f32 to vector<16x16xf32>
    %233 = arith.mulf %232, %218 : vector<16x16xf32>
    %234 = arith.addf %201, %233 : vector<16x16xf32>
    %c46 = arith.constant 46 : index
    %235 = memref.load %arg2[%c46] : memref<80xf32, #tpu.memory_space<smem>>
    %236 = vector.broadcast %235 : f32 to vector<16x16xf32>
    %237 = arith.mulf %236, %218 : vector<16x16xf32>
    %238 = arith.addf %205, %237 : vector<16x16xf32>
    %c56 = arith.constant 56 : index
    %239 = memref.load %arg2[%c56] : memref<80xf32, #tpu.memory_space<smem>>
    %240 = vector.broadcast %239 : f32 to vector<16x16xf32>
    %241 = arith.mulf %240, %218 : vector<16x16xf32>
    %242 = arith.addf %209, %241 : vector<16x16xf32>
    %c66 = arith.constant 66 : index
    %243 = memref.load %arg2[%c66] : memref<80xf32, #tpu.memory_space<smem>>
    %244 = vector.broadcast %243 : f32 to vector<16x16xf32>
    %245 = arith.mulf %244, %218 : vector<16x16xf32>
    %246 = arith.addf %213, %245 : vector<16x16xf32>
    %c76 = arith.constant 76 : index
    %247 = memref.load %arg2[%c76] : memref<80xf32, #tpu.memory_space<smem>>
    %248 = vector.broadcast %247 : f32 to vector<16x16xf32>
    %249 = arith.mulf %248, %218 : vector<16x16xf32>
    %250 = arith.addf %217, %249 : vector<16x16xf32>
    %251 = arith.mulf %8, %8 : vector<16x16xf32>
    %c7 = arith.constant 7 : index
    %252 = memref.load %arg2[%c7] : memref<80xf32, #tpu.memory_space<smem>>
    %253 = vector.broadcast %252 : f32 to vector<16x16xf32>
    %254 = arith.mulf %253, %251 : vector<16x16xf32>
    %255 = arith.addf %222, %254 : vector<16x16xf32>
    %c17 = arith.constant 17 : index
    %256 = memref.load %arg2[%c17] : memref<80xf32, #tpu.memory_space<smem>>
    %257 = vector.broadcast %256 : f32 to vector<16x16xf32>
    %258 = arith.mulf %257, %251 : vector<16x16xf32>
    %259 = arith.addf %226, %258 : vector<16x16xf32>
    %c27 = arith.constant 27 : index
    %260 = memref.load %arg2[%c27] : memref<80xf32, #tpu.memory_space<smem>>
    %261 = vector.broadcast %260 : f32 to vector<16x16xf32>
    %262 = arith.mulf %261, %251 : vector<16x16xf32>
    %263 = arith.addf %230, %262 : vector<16x16xf32>
    %c37 = arith.constant 37 : index
    %264 = memref.load %arg2[%c37] : memref<80xf32, #tpu.memory_space<smem>>
    %265 = vector.broadcast %264 : f32 to vector<16x16xf32>
    %266 = arith.mulf %265, %251 : vector<16x16xf32>
    %267 = arith.addf %234, %266 : vector<16x16xf32>
    %c47 = arith.constant 47 : index
    %268 = memref.load %arg2[%c47] : memref<80xf32, #tpu.memory_space<smem>>
    %269 = vector.broadcast %268 : f32 to vector<16x16xf32>
    %270 = arith.mulf %269, %251 : vector<16x16xf32>
    %271 = arith.addf %238, %270 : vector<16x16xf32>
    %c57 = arith.constant 57 : index
    %272 = memref.load %arg2[%c57] : memref<80xf32, #tpu.memory_space<smem>>
    %273 = vector.broadcast %272 : f32 to vector<16x16xf32>
    %274 = arith.mulf %273, %251 : vector<16x16xf32>
    %275 = arith.addf %242, %274 : vector<16x16xf32>
    %c67 = arith.constant 67 : index
    %276 = memref.load %arg2[%c67] : memref<80xf32, #tpu.memory_space<smem>>
    %277 = vector.broadcast %276 : f32 to vector<16x16xf32>
    %278 = arith.mulf %277, %251 : vector<16x16xf32>
    %279 = arith.addf %246, %278 : vector<16x16xf32>
    %c77 = arith.constant 77 : index
    %280 = memref.load %arg2[%c77] : memref<80xf32, #tpu.memory_space<smem>>
    %281 = vector.broadcast %280 : f32 to vector<16x16xf32>
    %282 = arith.mulf %281, %251 : vector<16x16xf32>
    %283 = arith.addf %250, %282 : vector<16x16xf32>
    %284 = arith.mulf %8, %11 : vector<16x16xf32>
    %c8 = arith.constant 8 : index
    %285 = memref.load %arg2[%c8] : memref<80xf32, #tpu.memory_space<smem>>
    %286 = vector.broadcast %285 : f32 to vector<16x16xf32>
    %287 = arith.mulf %286, %284 : vector<16x16xf32>
    %288 = arith.addf %255, %287 : vector<16x16xf32>
    %c18 = arith.constant 18 : index
    %289 = memref.load %arg2[%c18] : memref<80xf32, #tpu.memory_space<smem>>
    %290 = vector.broadcast %289 : f32 to vector<16x16xf32>
    %291 = arith.mulf %290, %284 : vector<16x16xf32>
    %292 = arith.addf %259, %291 : vector<16x16xf32>
    %c28 = arith.constant 28 : index
    %293 = memref.load %arg2[%c28] : memref<80xf32, #tpu.memory_space<smem>>
    %294 = vector.broadcast %293 : f32 to vector<16x16xf32>
    %295 = arith.mulf %294, %284 : vector<16x16xf32>
    %296 = arith.addf %263, %295 : vector<16x16xf32>
    %c38 = arith.constant 38 : index
    %297 = memref.load %arg2[%c38] : memref<80xf32, #tpu.memory_space<smem>>
    %298 = vector.broadcast %297 : f32 to vector<16x16xf32>
    %299 = arith.mulf %298, %284 : vector<16x16xf32>
    %300 = arith.addf %267, %299 : vector<16x16xf32>
    %c48 = arith.constant 48 : index
    %301 = memref.load %arg2[%c48] : memref<80xf32, #tpu.memory_space<smem>>
    %302 = vector.broadcast %301 : f32 to vector<16x16xf32>
    %303 = arith.mulf %302, %284 : vector<16x16xf32>
    %304 = arith.addf %271, %303 : vector<16x16xf32>
    %c58 = arith.constant 58 : index
    %305 = memref.load %arg2[%c58] : memref<80xf32, #tpu.memory_space<smem>>
    %306 = vector.broadcast %305 : f32 to vector<16x16xf32>
    %307 = arith.mulf %306, %284 : vector<16x16xf32>
    %308 = arith.addf %275, %307 : vector<16x16xf32>
    %c68 = arith.constant 68 : index
    %309 = memref.load %arg2[%c68] : memref<80xf32, #tpu.memory_space<smem>>
    %310 = vector.broadcast %309 : f32 to vector<16x16xf32>
    %311 = arith.mulf %310, %284 : vector<16x16xf32>
    %312 = arith.addf %279, %311 : vector<16x16xf32>
    %c78 = arith.constant 78 : index
    %313 = memref.load %arg2[%c78] : memref<80xf32, #tpu.memory_space<smem>>
    %314 = vector.broadcast %313 : f32 to vector<16x16xf32>
    %315 = arith.mulf %314, %284 : vector<16x16xf32>
    %316 = arith.addf %283, %315 : vector<16x16xf32>
    %317 = arith.mulf %11, %11 : vector<16x16xf32>
    %c9 = arith.constant 9 : index
    %318 = memref.load %arg2[%c9] : memref<80xf32, #tpu.memory_space<smem>>
    %319 = vector.broadcast %318 : f32 to vector<16x16xf32>
    %320 = arith.mulf %319, %317 : vector<16x16xf32>
    %321 = arith.addf %288, %320 : vector<16x16xf32>
    %c19 = arith.constant 19 : index
    %322 = memref.load %arg2[%c19] : memref<80xf32, #tpu.memory_space<smem>>
    %323 = vector.broadcast %322 : f32 to vector<16x16xf32>
    %324 = arith.mulf %323, %317 : vector<16x16xf32>
    %325 = arith.addf %292, %324 : vector<16x16xf32>
    %c29 = arith.constant 29 : index
    %326 = memref.load %arg2[%c29] : memref<80xf32, #tpu.memory_space<smem>>
    %327 = vector.broadcast %326 : f32 to vector<16x16xf32>
    %328 = arith.mulf %327, %317 : vector<16x16xf32>
    %329 = arith.addf %296, %328 : vector<16x16xf32>
    %c39 = arith.constant 39 : index
    %330 = memref.load %arg2[%c39] : memref<80xf32, #tpu.memory_space<smem>>
    %331 = vector.broadcast %330 : f32 to vector<16x16xf32>
    %332 = arith.mulf %331, %317 : vector<16x16xf32>
    %333 = arith.addf %300, %332 : vector<16x16xf32>
    %c49 = arith.constant 49 : index
    %334 = memref.load %arg2[%c49] : memref<80xf32, #tpu.memory_space<smem>>
    %335 = vector.broadcast %334 : f32 to vector<16x16xf32>
    %336 = arith.mulf %335, %317 : vector<16x16xf32>
    %337 = arith.addf %304, %336 : vector<16x16xf32>
    %c59 = arith.constant 59 : index
    %338 = memref.load %arg2[%c59] : memref<80xf32, #tpu.memory_space<smem>>
    %339 = vector.broadcast %338 : f32 to vector<16x16xf32>
    %340 = arith.mulf %339, %317 : vector<16x16xf32>
    %341 = arith.addf %308, %340 : vector<16x16xf32>
    %c69 = arith.constant 69 : index
    %342 = memref.load %arg2[%c69] : memref<80xf32, #tpu.memory_space<smem>>
    %343 = vector.broadcast %342 : f32 to vector<16x16xf32>
    %344 = arith.mulf %343, %317 : vector<16x16xf32>
    %345 = arith.addf %312, %344 : vector<16x16xf32>
    %c79 = arith.constant 79 : index
    %346 = memref.load %arg2[%c79] : memref<80xf32, #tpu.memory_space<smem>>
    %347 = vector.broadcast %346 : f32 to vector<16x16xf32>
    %348 = arith.mulf %347, %317 : vector<16x16xf32>
    %349 = arith.addf %316, %348 : vector<16x16xf32>
    %c0_23 = arith.constant 0 : index
    %c0_24 = arith.constant 0 : index
    %c0_25 = arith.constant 0 : index
    %c0_26 = arith.constant 0 : index
    %350 = vector.load %arg4[%c0_23, %c0_24, %c0_25, %c0_26] : memref<1x8x16x16xf32, #tpu.memory_space<vmem>>, vector<1x1x16x16xf32>
    %351 = vector.shape_cast %350 : vector<1x1x16x16xf32> to vector<16x16xf32>
    %352 = vector.shape_cast %321 : vector<16x16xf32> to vector<1x1x16x16xf32>
    tpu.vector_store %arg4[%c0_23, %c0_24, %c0_25, %c0_26], %352 {strides = array<i32>} : memref<1x8x16x16xf32, #tpu.memory_space<vmem>>, vector<1x1x16x16xf32>,
    %c0_27 = arith.constant 0 : index
    %c1_28 = arith.constant 1 : index
    %c0_29 = arith.constant 0 : index
    %c0_30 = arith.constant 0 : index
    %353 = vector.load %arg4[%c0_27, %c1_28, %c0_29, %c0_30] : memref<1x8x16x16xf32, #tpu.memory_space<vmem>>, vector<1x1x16x16xf32>
    %354 = vector.shape_cast %353 : vector<1x1x16x16xf32> to vector<16x16xf32>
    %355 = vector.shape_cast %325 : vector<16x16xf32> to vector<1x1x16x16xf32>
    tpu.vector_store %arg4[%c0_27, %c1_28, %c0_29, %c0_30], %355 {strides = array<i32>} : memref<1x8x16x16xf32, #tpu.memory_space<vmem>>, vector<1x1x16x16xf32>,
    %c0_31 = arith.constant 0 : index
    %c2_32 = arith.constant 2 : index
    %c0_33 = arith.constant 0 : index
    %c0_34 = arith.constant 0 : index
    %356 = vector.load %arg4[%c0_31, %c2_32, %c0_33, %c0_34] : memref<1x8x16x16xf32, #tpu.memory_space<vmem>>, vector<1x1x16x16xf32>
    %357 = vector.shape_cast %356 : vector<1x1x16x16xf32> to vector<16x16xf32>
    %358 = vector.shape_cast %329 : vector<16x16xf32> to vector<1x1x16x16xf32>
    tpu.vector_store %arg4[%c0_31, %c2_32, %c0_33, %c0_34], %358 {strides = array<i32>} : memref<1x8x16x16xf32, #tpu.memory_space<vmem>>, vector<1x1x16x16xf32>,
    %c0_35 = arith.constant 0 : index
    %c3_36 = arith.constant 3 : index
    %c0_37 = arith.constant 0 : index
    %c0_38 = arith.constant 0 : index
    %359 = vector.load %arg4[%c0_35, %c3_36, %c0_37, %c0_38] : memref<1x8x16x16xf32, #tpu.memory_space<vmem>>, vector<1x1x16x16xf32>
    %360 = vector.shape_cast %359 : vector<1x1x16x16xf32> to vector<16x16xf32>
    %361 = vector.shape_cast %333 : vector<16x16xf32> to vector<1x1x16x16xf32>
    tpu.vector_store %arg4[%c0_35, %c3_36, %c0_37, %c0_38], %361 {strides = array<i32>} : memref<1x8x16x16xf32, #tpu.memory_space<vmem>>, vector<1x1x16x16xf32>,
    %c0_39 = arith.constant 0 : index
    %c4_40 = arith.constant 4 : index
    %c0_41 = arith.constant 0 : index
    %c0_42 = arith.constant 0 : index
    %362 = vector.load %arg4[%c0_39, %c4_40, %c0_41, %c0_42] : memref<1x8x16x16xf32, #tpu.memory_space<vmem>>, vector<1x1x16x16xf32>
    %363 = vector.shape_cast %362 : vector<1x1x16x16xf32> to vector<16x16xf32>
    %364 = vector.shape_cast %337 : vector<16x16xf32> to vector<1x1x16x16xf32>
    tpu.vector_store %arg4[%c0_39, %c4_40, %c0_41, %c0_42], %364 {strides = array<i32>} : memref<1x8x16x16xf32, #tpu.memory_space<vmem>>, vector<1x1x16x16xf32>,
    %c0_43 = arith.constant 0 : index
    %c5_44 = arith.constant 5 : index
    %c0_45 = arith.constant 0 : index
    %c0_46 = arith.constant 0 : index
    %365 = vector.load %arg4[%c0_43, %c5_44, %c0_45, %c0_46] : memref<1x8x16x16xf32, #tpu.memory_space<vmem>>, vector<1x1x16x16xf32>
    %366 = vector.shape_cast %365 : vector<1x1x16x16xf32> to vector<16x16xf32>
    %367 = vector.shape_cast %341 : vector<16x16xf32> to vector<1x1x16x16xf32>
    tpu.vector_store %arg4[%c0_43, %c5_44, %c0_45, %c0_46], %367 {strides = array<i32>} : memref<1x8x16x16xf32, #tpu.memory_space<vmem>>, vector<1x1x16x16xf32>,
    %c0_47 = arith.constant 0 : index
    %c6_48 = arith.constant 6 : index
    %c0_49 = arith.constant 0 : index
    %c0_50 = arith.constant 0 : index
    %368 = vector.load %arg4[%c0_47, %c6_48, %c0_49, %c0_50] : memref<1x8x16x16xf32, #tpu.memory_space<vmem>>, vector<1x1x16x16xf32>
    %369 = vector.shape_cast %368 : vector<1x1x16x16xf32> to vector<16x16xf32>
    %370 = vector.shape_cast %345 : vector<16x16xf32> to vector<1x1x16x16xf32>
    tpu.vector_store %arg4[%c0_47, %c6_48, %c0_49, %c0_50], %370 {strides = array<i32>} : memref<1x8x16x16xf32, #tpu.memory_space<vmem>>, vector<1x1x16x16xf32>,
    %c0_51 = arith.constant 0 : index
    %c7_52 = arith.constant 7 : index
    %c0_53 = arith.constant 0 : index
    %c0_54 = arith.constant 0 : index
    %371 = vector.load %arg4[%c0_51, %c7_52, %c0_53, %c0_54] : memref<1x8x16x16xf32, #tpu.memory_space<vmem>>, vector<1x1x16x16xf32>
    %372 = vector.shape_cast %371 : vector<1x1x16x16xf32> to vector<16x16xf32>
    %373 = vector.shape_cast %349 : vector<16x16xf32> to vector<1x1x16x16xf32>
    tpu.vector_store %arg4[%c0_51, %c7_52, %c0_53, %c0_54], %373 {strides = array<i32>} : memref<1x8x16x16xf32, #tpu.memory_space<vmem>>, vector<1x1x16x16xf32>,
    return
  }
  func.func @transform_0(%arg0: i32, %arg1: i32) -> i32 {
    %c0_i32 = arith.constant 0 : i32
    %c0_i32_0 = arith.constant 0 : i32
    return %c0_i32 : i32
  }
  func.func @transform_1(%arg0: i32, %arg1: i32) -> (i32, i32, i32, i32) {
    %c0_i32 = arith.constant 0 : i32
    %c0_i32_0 = arith.constant 0 : i32
    %c0_i32_1 = arith.constant 0 : i32
    return %arg0, %c0_i32, %c0_i32_0, %arg1 : i32, i32, i32, i32
  }
  func.func @transform_2(%arg0: i32, %arg1: i32) -> (i32, i32, i32, i32) {
    %c0_i32 = arith.constant 0 : i32
    %c0_i32_0 = arith.constant 0 : i32
    %c0_i32_1 = arith.constant 0 : i32
    return %arg0, %c0_i32, %arg1, %c0_i32_0 : i32, i32, i32, i32
  }
}

</mosaic_0001>

<bundles_post_ra>
// kernel: tpu_custom_call.1
= control target key start
LH: loop header
LB: loop body
LE: loop exit
PB: predicated region body
PF: predicated region fallthrough
CT: control target
= control target key end

     0   :  { %s2437_s0 = inlined_call_operand.hbm [shape: f32[80], index: 0, kind: input, shape index: {}]   ;;  %s2438_s1 = inlined_call_operand.hbm [shape: f32[2,4,16,16], index: 1, kind: input, shape index: {}]   ;;  %s2439_s2 = inlined_call_operand.hbm [shape: f32[2,8,16,16], index: 2, kind: output, shape index: {}]  }
   0x1   :  { %2581 = sst [smem:[#allocation139_spill]] %s2437_s0 }
   0x2   :  { %2582 = sst [smem:[#allocation140_spill]] %s2438_s1 }
   0x3   :  { %2583 = sst [smem:[#allocation141_spill]] %s2439_s2 }
   0x4   :  { %7 = vsyncpa [#allocation5], 0 }
   0x5   :  { %8 = vsyncpa [#allocation3], 0 }
   0x6   :  { %10 = vsyncpa [#allocation3 + $0x1], 0 }
   0x7   :  { %11 = vsyncpa [#allocation4], 0 }
   0x8   :  { %13 = vsyncpa [#allocation4 + $0x1], 0  ;;  %s1318_s9 = smov 0   ;;  %s1320_s10 = smov 0  }
   0x9   :  { %s1322_s11 = smov 0   ;;  %s1324_s12 = smov 0  }
   0xa   :  { %s1326_s13 = smov 0   ;;  %s1328_s14 = smov 0  }
   0xb LB: > { %2584 = sst [smem:[#allocation11_spill]] %s1274_s9  ;;  %s969_s15 = sadd.s32 4294967295, %s1294_s14   ;;  %s1294_s14 = sphi %s1328_s14, %s19_s14   ;;  %s1290_s13 = sphi %s1326_s13, %s3006_s13   ;;  %s1286_s12 = sphi %s1324_s12, %s3005_s12   ;;  %s1282_s11 = sphi %s1322_s11, %s3004_s11   ;;  %s1278_s10 = sphi %s1320_s10, %s3003_s10   ;;  %s1274_s9 = sphi %s1318_s9, %s3002_s9  }
   0xc   : > { %2585 = sst [smem:[#allocation12_spill]] %s1278_s10  ;;  %s970_s16 = sadd.s32 4294967294, %s1294_s14  }
   0xd   : > { %2586 = sst [smem:[#allocation13_spill]] %s1282_s11  ;;  %s61_s17 = sadd.s32 1, %s1282_s11 }
   0xe   : > { %2587 = sst [smem:[#allocation14_spill]] %s1286_s12  ;;  %p68_p0 = scmp.ne.s32.totalorder %s1282_s11, %s1278_s10 }
   0xf   : > { %2588 = sst [smem:[#allocation15_spill]] %s1290_s13  ;;  %p69_p1 = scmp.eq.s32.totalorder %s1294_s14, 0 }
  0x10   : > { %2589 = sst [smem:[#allocation16_spill]] %s1294_s14  ;;  %p74_p2 = scmp.ne.s32.totalorder %s1278_s10, %s1274_s9 }
  0x11   : > { %p1356_p3 = scmp.eq.s32.totalorder %s969_s15, 0  ;;  %p100_p4 = scmp.eq.s32.totalorder %s969_s15, 1 }
  0x12   : > { %p70_p5 = por %p69_p1, %p68_p0  ;;  %p106_p6 = scmp.eq.s32.totalorder %s970_s16, 1 }
  0x13   : > { %s2590_s18 = scalar_select %p1356_p3, 1, 0 }
  0x14   : > { %p1362_p7 = por %p1356_p3, %p74_p2  ;;  %p1366_p8 = por %p100_p4, %p68_p0 }
  0x15   : > { %p1370_p9 = por %p106_p6, %p74_p2  ;;  %p971_p10 = scmp.ge.s32.totalorder %s1294_s14, 1 }
  0x16   : > { %s2591_s19 = scalar_select %p1362_p7, 1, 0 }
  0x17   : > { %s2592_s20 = scalar_select %p1366_p8, 1, 0 }
  0x18   : > { %s2594_s21 = scalar_select %p1370_p9, 1, 0 }
  0x19   : > { %2593 = sst [smem:[#allocation17_spill]] %s2592_s20  ;;  %p113_p11 = scmp.lt.s32.totalorder %s1294_s14, 3 }
  0x1a   : > { %2595 = sst [smem:[#allocation18_spill]] %s2594_s21  ;;  %p1108_p1 = scmp.lt.s32.totalorder %s1294_s14, 2 }
  0x1b   : > { %p1377_p13 = pnand %p971_p10, %p113_p11  ;;  %s135_s23 = sand.u32 1, %s1282_s11  }
  0x1c   : > { %p1385_p0 = pnand %p1108_p1, %p70_p5  ;;  %s31_s25 = sadd.s32 1, %s1290_s13 }
  0x1d   : > { %p1095_p7 = pneg %p1377_p13  ;;  %s974_s26 = sshll.u32 %s135_s23, 6 }
  0x1e   : > { %p33_p4 = scmp.ge.s32.totalorder %s31_s25, 2  ;;  %s2598_s0 = sld [smem:[#allocation139_spill]] }
  0x1f   : > { %p1096_p2 = pnand %p1095_p7, %p1356_p3 }
  0x21   : > { %p1167_p10 = pneg %p1096_p2 }
  0x24   : > { %s1165_s29 = scalar_lea.hbm %s2598_s0, 16 }
  0x25   : > { %p1166_p6 = scmp.ne.s32.totalorder %s2598_s0, %s1165_s29  ;;  %p1172_p5 = scmp.lt.u32.totalorder %s1165_s29, %s2598_s0 }
  0x27   : > { %p1168_p11 = pnand %p1167_p10, %p1166_p6 }
  0x29   : > { %p1169_p12 = pneg %p1168_p11 }
  0x2b   : > { %p1174_p1 = pnand %p1172_p5, %p1169_p12 }
  0x2d   : > { %1177 = shalt.err (!%p1174_p1)
}
  0x2e   : > { %s1296_s6 = smov [#allocation2]   ;;  %s3008_s25 = smov (%p33_p4, %s31_s25), 0 }
  0x2f   : > { %1098 = dma.hbm_to_smem (!%p1096_p2), %s2598_s0, 16, %s1296_s6, [#allocation5]  }
  0x30   : > { %2599 = sst [smem:[#allocation19_spill]] %s3008_s25  ;;  %s1085_s15 = sshll.u32 %s1290_s13, 10 }
  0x31   : > { %s56_s16 = ssub.s32 %s1290_s13, %s3008_s25  ;;  %s2600_s1 = sld [smem:[#allocation140_spill]] }
  0x32   : > { %p59_p7 = scmp.eq.s32.totalorder %s56_s16, 0  ;;  %s139_s30 = scalar_lea.vmem [#allocation6], %s974_s26 }
  0x33   : > { %s147_s3 = sshll.u32 %s139_s30, 4  ;;  %s1421_s5 = scalar_lea.sflag [#allocation3], %s135_s23  ;;  %s1414_s3 = int_to_ptr.vmem [resolvable:$true] %s147_s3 }
  0x34   : > { %s1419_s4 = scalar_select %p59_p7, %s1282_s11, %s61_s17  }
  0x35   : > { %p1180_p2 = pneg %p1385_p0 }
  0x36   : > { %2601 = sst [smem:[#allocation20_spill]] %s1419_s4 }
  0x37   : > { %s1412_s29 = scalar_lea.hbm %s2600_s1, %s1085_s15  ;;  %s1183_s26 = scalar_lea.hbm %s2600_s1, 2048 }
  0x38   : > { %s1178_s6 = scalar_lea.hbm %s1412_s29, 1024  ;;  %p1184_p10 = scmp.lt.u32.totalorder %s1412_s29, %s2600_s1 }
  0x39   : > { %p1179_p12 = scmp.ne.s32.totalorder %s1412_s29, %s1178_s6  ;;  %p1185_p11 = scmp.lt.u32.totalorder %s1183_s26, %s1178_s6 }
  0x3a   : > { %p1187_p1 = scmp.lt.u32.totalorder %s1178_s6, %s1412_s29 }
  0x3b   : > { %p1181_p4 = pnand %p1180_p2, %p1179_p12  ;;  %p1186_p5 = por %p1185_p11, %p1184_p10 }
  0x3d   : > { %p1182_p6 = pneg %p1181_p4  ;;  %p1188_p7 = por %p1187_p1, %p1186_p5 }
  0x3f   : > { %p1189_p9 = pnand %p1188_p7, %p1182_p6 }
  0x41   : > { %1192 = shalt.err (!%p1189_p9)
}
  0x42   : > { %s1193_s17 = scalar_lea.vmem %s1414_s3, 1024  ;;  %s1297_s23 = smov [#allocation6]  }
  0x43   : > { %p1194_p12 = scmp.ne.s32.totalorder %s1414_s3, %s1193_s17  ;;  %s1198_s27 = sshll.u32 %s1297_s23, 4  ;;  %s1199_s27 = int_to_ptr.vmem [resolvable:$false] %s1198_s27 }
  0x44   : > { %s1200_s28 = scalar_lea.vmem %s1199_s27, 2048  ;;  %p1201_p3 = scmp.lt.s32.totalorder %s1414_s3, %s1199_s27 }
  0x45   : > { %p1196_p4 = pnand %p1194_p12, %p1180_p2  ;;  %p1202_p10 = scmp.lt.s32.totalorder %s1200_s28, %s1193_s17 }
  0x47   : > { %p1197_p8 = pneg %p1196_p4  ;;  %p1203_p11 = por %p1202_p10, %p1201_p3 }
  0x49   : > { %p1204_p5 = pnand %p1203_p11, %p1197_p8 }
  0x4b   : > { %1207 = shalt.err (!%p1204_p5)
}
  0x4c   : > { %s1298_s30 = smov 128   ;;  %s1299_s6 = smov 8  }
  0x4d   : > { %1102 = dma.hbm_to_vmem [thread:$0]  (!%p1385_p0), %s1412_s29, 1024, %s1414_s3, %s1421_s5, %s1298_s30, %s1298_s30, %s1299_s6  }
  0x4e   : > { %159 = sbr.rel (%p1377_p13) target bundleno = 352 (0x160), region = 28 }
  0x55   : > { %p2602_p9 = scmp.ne.s32.totalorder %s2590_s18, 0 }
  0x57   : > { %1261 = dma.done.wait (%p2602_p9), [#allocation5], 16  }
  0x58   : > { %1263 = vsyncadd (%p2602_p9), [#allocation5], 4294967280  ;;  %s1456_s7 = sand.u32 1, %s1278_s10   ;;  %p2604_p3 = scmp.ne.s32.totalorder %s2591_s19, 0 }
  0x59   : > { %2603 = sst [smem:[#allocation21_spill]] %s1456_s7  ;;  %s979_s8 = sshll.u32 %s1456_s7, 6 }
  0x5a   : > { %s166_s26 = scalar_lea.sflag [#allocation3], %s1456_s7  ;;  %s169_s15 = scalar_lea.vmem [#allocation6], %s979_s8 }
  0x5b   : > { %1265 = dma.done.wait (%p2604_p3), %s166_s26, 1024  }
  0x5c   : > { %1267 = vsyncadd (%p2604_p3), %s166_s26, 4294966272 }
  0x5d   : > { %174 = sfence }
  0x5e   : > { %v981_v0 = vld [vmem:[%s169_s15 + $0x10] sm:$0xff]  ;;  %v192_v1 = vld [vmem:[%s169_s15] sm:$0xff]  ;;  %v982_v2 = vld [vmem:[%s169_s15 + $0x18] sm:$0xff]  ;;  %s1464_s18 = sld [smem:[#allocation2 + $0x4]]  ;;  %s1466_s19 = sld [smem:[#allocation2 + $0xe]]  ;;  %vm831_vm0 = vcmask 130048  }
  0x5f   : > { %229 = vxpose.xlu1.b32.start [1/2] (short) (narrow) %v981_v0, 16  ;;  %194 = vxpose.xlu0.b32.start [1/2] (short) (narrow) %v192_v1, 16  ;;  %v193_v3 = vld [vmem:[%s169_s15 + $0x8] sm:$0xff]  ;;  %v985_v4 = vld [vmem:[%s169_s15 + $0x30] sm:$0xff]  ;;  %v983_v5 = vld [vmem:[%s169_s15 + $0x20] sm:$0xff]  ;;  %s1468_s22 = sld [smem:[#allocation2 + $0x18]] }
  0x60   : > { %v986_v6 = vld [vmem:[%s169_s15 + $0x38] sm:$0xff]  ;;  %v984_v7 = vld [vmem:[%s169_s15 + $0x28] sm:$0xff]  ;;  %s1470_s24 = sld [smem:[#allocation2 + $0x22]]  ;;  %s1472_s29 = sld [smem:[#allocation2 + $0x2c]] }
  0x61   : > { %s1474_s3 = sld [smem:[#allocation2 + $0x36]]  ;;  %s1476_s5 = sld [smem:[#allocation2 + $0x40]] }
  0x62   : > { %s1478_s16 = sld [smem:[#allocation2 + $0x4a]]  ;;  %s1480_s17 = sld [smem:[#allocation2]] }
  0x63   : > { %230 = vxpose.xlu1.b32.end [2/2] (short) (narrow) %v982_v2, 16  ;;  %195 = vxpose.xlu0.b32.end [2/2] (short) (narrow) %v193_v3, 16  ;;  %s1482_s23 = sld [smem:[#allocation2 + $0xa]]  ;;  %s1484_s27 = sld [smem:[#allocation2 + $0x14]] }
  0x64   : > { %2605 = sst [smem:[#allocation22_spill]] %s1464_s18  ;;  %s1486_s28 = sld [smem:[#allocation2 + $0x1e]]  ;;  %v534_v8 = vstv %s1464_s18  ;;  %v540_v9 = vstv %s1466_s19 }
  0x65   : > { %2606 = sst [smem:[#allocation23_spill]] %s1466_s19  ;;  %s1488_s30 = sld [smem:[#allocation2 + $0x28]]  ;;  %v546_v10 = vstv %s1468_s22 }
  0x66   : > { %2607 = sst [smem:[#allocation24_spill]] %s1468_s22  ;;  %s1490_s6 = sld [smem:[#allocation2 + $0x32]]  ;;  %v552_v11 = vstv %s1470_s24  ;;  %v558_v12 = vstv %s1472_s29 }
  0x67   : > { %299 = vxpose.xlu1.b32.start [1/2] (short) (narrow) %v985_v4, 16  ;;  %264 = vxpose.xlu0.b32.start [1/2] (short) (narrow) %v983_v5, 16  ;;  %2608 = sst [smem:[#allocation25_spill]] %s1470_s24  ;;  %s1492_s8 = sld [smem:[#allocation2 + $0x3c]]  ;;  %v564_v13 = vstv %s1474_s3  ;;  %v570_v14 = vstv %s1476_s5 }
  0x68   : > { %2609 = sst [smem:[#allocation26_spill]] %s1472_s29  ;;  %s1494_s26 = sld [smem:[#allocation2 + $0x46]]  ;;  %v576_v15 = vstv %s1478_s16  ;;  %v334_v16 = vstv %s1480_s17 }
  0x69   : > { %2610 = sst [smem:[#allocation27_spill]] %s1474_s3  ;;  %s1496_s15 = sld [smem:[#allocation2 + $0x1]]  ;;  %v340_v17 = vstv %s1482_s23  ;;  %v346_v18 = vstv %s1484_s27 }
  0x6a   : > { %2611 = sst [smem:[#allocation28_spill]] %s1476_s5  ;;  %s1498_s0 = sld [smem:[#allocation2 + $0xb]]  ;;  %v352_v19 = vstv %s1486_s28 }
  0x6b   : > { %300 = vxpose.xlu1.b32.end [2/2] (short) (narrow) %v986_v6, 16  ;;  %265 = vxpose.xlu0.b32.end [2/2] (short) (narrow) %v984_v7, 16  ;;  %2612 = sst [smem:[#allocation29_spill]] %s1478_s16  ;;  %s1500_s1 = sld [smem:[#allocation2 + $0x15]]  ;;  %v358_v20 = vstv %s1488_s30 }
  0x6c   : > { %2613 = sst [smem:[#allocation30_spill]] %s1480_s17  ;;  %s1502_s25 = sld [smem:[#allocation2 + $0x1f]]  ;;  %v364_v21 = vstv %s1490_s6 }
  0x6d   : > { %2614 = sst [smem:[#allocation31_spill]] %s1482_s23  ;;  %s1504_s13 = sld [smem:[#allocation2 + $0x29]]  ;;  %v370_v22 = vstv %s1492_s8 }
  0x6e   : > { %2615 = sst [smem:[#allocation32_spill]] %s1484_s27  ;;  %s1506_s4 = sld [smem:[#allocation2 + $0x33]]  ;;  %v376_v23 = vstv %s1494_s26 }
  0x6f   : > { %2616 = sst [smem:[#allocation33_spill]] %s1486_s28  ;;  %s1508_s11 = sld [smem:[#allocation2 + $0x3d]]  ;;  %v384_v24 = vstv %s1496_s15 }
  0x70   : > { %2617 = sst [smem:[#allocation34_spill]] %s1488_s30  ;;  %s1512_s14 = sld [smem:[#allocation2 + $0x3]]  ;;  %v390_v25 = vstv %s1498_s0 }
  0x71   : > { %2618 = sst [smem:[#allocation35_spill]] %s1490_s6  ;;  %s1510_s10 = sld [smem:[#allocation2 + $0x47]]  ;;  %v396_v26 = vstv %s1500_s1 }
  0x72   : > { %2619 = sst [smem:[#allocation36_spill]] %s1492_s8  ;;  %s1514_s21 = sld [smem:[#allocation2 + $0xd]]  ;;  %v402_v27 = vstv %s1502_s25 }
  0x73   : > { %2620 = sst [smem:[#allocation37_spill]] %s1494_s26  ;;  %s1516_s9 = sld [smem:[#allocation2 + $0x17]] }
  0x74   : > { %2621 = sst [smem:[#allocation38_spill]] %s1496_s15  ;;  %s1518_s20 = sld [smem:[#allocation2 + $0x21]] }
  0x75   : > { %2622 = sst [smem:[#allocation39_spill]] %s1498_s0  ;;  %s1520_s2 = sld [smem:[#allocation2 + $0x2b]] }
  0x76   : > { %2623 = sst [smem:[#allocation40_spill]] %s1500_s1  ;;  %s1524_s7 = sld [smem:[#allocation2 + $0x3f]] }
  0x77   : > { %2624 = sst [smem:[#allocation41_spill]] %s1502_s25  ;;  %s1522_s12 = sld [smem:[#allocation2 + $0x35]] }
  0x78   : > { %2625 = sst [smem:[#allocation42_spill]] %s1504_s13  ;;  %s1526_s13 = sld [smem:[#allocation2 + $0x49]] }
  0x79   : > { %2626 = sst [smem:[#allocation43_spill]] %s1506_s4  ;;  %s1528_s4 = sld [smem:[#allocation2 + $0x6]] }
  0x7a   : > { %2627 = sst [smem:[#allocation44_spill]] %s1508_s11  ;;  %s1530_s11 = sld [smem:[#allocation2 + $0x10]] }
  0x7b   : > { %2628 = sst [smem:[#allocation45_spill]] %s1510_s10  ;;  %s1586_s19 = sld [smem:[#allocation2 + $0xf]] }
  0x7c   : > { %2629 = sst [smem:[#allocation46_spill]] %s1512_s14  ;;  %s1532_s10 = sld [smem:[#allocation2 + $0x1a]] }
  0x7d   : > { %2630 = sst [smem:[#allocation47_spill]] %s1514_s21  ;;  %s1536_s21 = sld [smem:[#allocation2 + $0x2e]] }
  0x7e   : > { %2631 = sst [smem:[#allocation48_spill]] %s1516_s9  ;;  %s1534_s14 = sld [smem:[#allocation2 + $0x24]] }
  0x7f   : > { %2632 = sst [smem:[#allocation49_spill]] %s1518_s20  ;;  %s1538_s9 = sld [smem:[#allocation2 + $0x38]] }
  0x80   : > { %2633 = sst [smem:[#allocation50_spill]] %s1520_s2  ;;  %s1540_s20 = sld [smem:[#allocation2 + $0x42]] }
  0x81   : > { %2634 = sst [smem:[#allocation51_spill]] %s1522_s12  ;;  %s1542_s12 = sld [smem:[#allocation2 + $0x4c]] }
  0x82   : > { %2635 = sst [smem:[#allocation52_spill]] %s1524_s7  ;;  %s2660_s24 = sld [smem:[#allocation42_spill]] }
  0x83   : > { %2636 = sst [smem:[#allocation53_spill]] %s1526_s13  ;;  %s1544_s7 = sld [smem:[#allocation2 + $0x9]] }
  0x84   : > { %2637 = sst [smem:[#allocation54_spill]] %s1528_s4  ;;  %s2661_s22 = sld [smem:[#allocation43_spill]] }
  0x85   : > { %2638 = sst [smem:[#allocation55_spill]] %s1530_s11  ;;  %s1546_s4 = sld [smem:[#allocation2 + $0x13]] }
  0x86   : > { %2639 = sst [smem:[#allocation56_spill]] %s1532_s10  ;;  %s1550_s10 = sld [smem:[#allocation2 + $0x27]] }
  0x87   : > { %2640 = sst [smem:[#allocation57_spill]] %s1534_s14  ;;  %s1548_s11 = sld [smem:[#allocation2 + $0x1d]] }
  0x88   : > { %2641 = sst [smem:[#allocation58_spill]] %s1536_s21  ;;  %s1552_s14 = sld [smem:[#allocation2 + $0x31]]  ;;  %v408_v28 = vstv %s2660_s24 }
  0x89   : > { %2642 = sst [smem:[#allocation59_spill]] %s1538_s9  ;;  %s1554_s9 = sld [smem:[#allocation2 + $0x3b]] }
  0x8a   : > { %2643 = sst [smem:[#allocation60_spill]] %s1540_s20  ;;  %s1556_s20 = sld [smem:[#allocation2 + $0x45]]  ;;  %v414_v29 = vstv %s2661_s22 }
  0x8b   : > { %2644 = sst [smem:[#allocation61_spill]] %s1542_s12  ;;  %s1558_s12 = sld [smem:[#allocation2 + $0x4f]] }
  0x8c   : > { %2645 = sst [smem:[#allocation62_spill]] %s1544_s7  ;;  %s1560_s7 = sld [smem:[#allocation2 + $0x2]] }
  0x8d   : > { %2646 = sst [smem:[#allocation63_spill]] %s1546_s4  ;;  %s1564_s21 = sld [smem:[#allocation2 + $0x16]] }
  0x8e   : > { %2647 = sst [smem:[#allocation64_spill]] %s1548_s11  ;;  %s1562_s4 = sld [smem:[#allocation2 + $0xc]] }
  0x8f   : > { %2648 = sst [smem:[#allocation65_spill]] %s1550_s10  ;;  %s1566_s10 = sld [smem:[#allocation2 + $0x20]] }
  0x90   : > { %2649 = sst [smem:[#allocation66_spill]] %s1552_s14  ;;  %s1568_s14 = sld [smem:[#allocation2 + $0x2a]] }
  0x91   : > { %2650 = sst [smem:[#allocation67_spill]] %s1554_s9  ;;  %s1570_s9 = sld [smem:[#allocation2 + $0x34]] }
  0x92   : > { %2651 = sst [smem:[#allocation68_spill]] %s1556_s20  ;;  %s1594_s3 = sld [smem:[#allocation2 + $0x23]] }
  0x93   : > { %2652 = sst [smem:[#allocation69_spill]] %s1558_s12  ;;  %s1592_s18 = sld [smem:[#allocation2 + $0x19]] }
  0x94   : > { %2653 = sst [smem:[#allocation70_spill]] %s1560_s7  ;;  %s1576_s7 = sld [smem:[#allocation2 + $0x3e]] }
  0x95   : > { %2654 = sst [smem:[#allocation71_spill]] %s1564_s21  ;;  %s1578_s21 = sld [smem:[#allocation2 + $0x48]] }
  0x96   : > { %2655 = sst [smem:[#allocation72_spill]] %s1566_s10  ;;  %s2663_s29 = sld [smem:[#allocation44_spill]] }
  0x97   : > { %2656 = sst [smem:[#allocation73_spill]] %s1570_s9  ;;  %s1584_s9 = sld [smem:[#allocation2 + $0x5]] }
  0x98   : > { %2659 = sst [smem:[#allocation76_spill]] %s1586_s19  ;;  %s2665_s5 = sld [smem:[#allocation45_spill]] }
  0x99   : > { %2662 = sst [smem:[#allocation77_spill]] %s1592_s18  ;;  %s1600_s19 = sld [smem:[#allocation2 + $0x2d]] }
  0x9a   : > { %2664 = sst [smem:[#allocation78_spill]] %s1594_s3  ;;  %s1602_s23 = sld [smem:[#allocation2 + $0x37]] }
  0x9b   : > { %2657 = sst [smem:[#allocation74_spill]] %s1578_s21  ;;  %s1608_s3 = sld [smem:[#allocation2 + $0x41]] }
  0x9c   : > { %s1610_s6 = sld [smem:[#allocation2 + $0x4b]]  ;;  %v420_v30 = vstv %s2663_s29  ;;  %s2677_s8 = sld [smem:[#allocation55_spill]] }
  0x9d   : > { %2658 = sst [smem:[#allocation75_spill]] %s1584_s9  ;;  %s2676_s26 = sld [smem:[#allocation54_spill]] }
  0x9e   : > { %v426_v31 = vstv %s2665_s5  ;;  %s2679_s15 = sld [smem:[#allocation56_spill]]  ;;  %s1618_s0 = sld [smem:[#allocation2 + $0x11]] }
  0x9f   : > { %2668 = sst [smem:[#allocation79_spill]] %s1600_s19  ;;  %s1626_s22 = sld [smem:[#allocation2 + $0x25]] }
  0xa0   : > { %2670 = sst [smem:[#allocation80_spill]] %s1602_s23  ;;  %s1616_s23 = sld [smem:[#allocation2 + $0x7]] }
  0xa1   : > { %2673 = sst [smem:[#allocation81_spill]] %s1608_s3  ;;  %s1634_s9 = sld [smem:[#allocation2 + $0x39]] }
  0xa2   : > { %2675 = sst [smem:[#allocation82_spill]] %s1610_s6  ;;  %s1624_s6 = sld [smem:[#allocation2 + $0x1b]]  ;;  %v2576_v41 = vstv %s2677_s8 }
  0xa3   : > { %v2577_v40 = vstv %s2676_s26  ;;  %s1642_s28 = sld [smem:[#allocation2 + $0x4d]]  ;;  %s2697_s13 = sld [smem:[#allocation70_spill]] }
  0xa4   : > { %2680 = sst [smem:[#allocation84_spill]] %s1618_s0  ;;  %s1632_s0 = sld [smem:[#allocation2 + $0x2f]]  ;;  %v2575_v42 = vstv %s2679_s15 }
  0xa5   : > { %2686 = sst [smem:[#allocation86_spill]] %s1626_s22  ;;  %s1648_s30 = sld [smem:[#allocation2 + $0x8]] }
  0xa6   : > { %2678 = sst [smem:[#allocation83_spill]] %s1616_s23  ;;  %s1640_s22 = sld [smem:[#allocation2 + $0x43]] }
  0xa7   : > { %2691 = sst [smem:[#allocation88_spill]] %s1634_s9  ;;  %s2699_s2 = sld [smem:[#allocation71_spill]] }
  0xa8   : > { %2684 = sst [smem:[#allocation85_spill]] %s1624_s6  ;;  %s2701_s1 = sld [smem:[#allocation73_spill]] }
  0xa9   : > { %2696 = sst [smem:[#allocation90_spill]] %s1642_s28  ;;  %s1650_s8 = sld [smem:[#allocation2 + $0x12]] }
  0xaa   : > { %2690 = sst [smem:[#allocation87_spill]] %s1632_s0  ;;  %s1658_s3 = sld [smem:[#allocation2 + $0x26]] }
  0xab   : > { %2698 = sst [smem:[#allocation70_spill]] %s1648_s30  ;;  %s1656_s15 = sld [smem:[#allocation2 + $0x1c]] }
  0xac   : > { %2695 = sst [smem:[#allocation89_spill]] %s1640_s22  ;;  %s2704_s29 = sld [smem:[#allocation75_spill]] }
  0xad   : > { %s1664_s5 = sld [smem:[#allocation2 + $0x30]]  ;;  %s1666_s11 = sld [smem:[#allocation2 + $0x3a]] }
  0xae   : > { %s1672_s16 = sld [smem:[#allocation2 + $0x44]]  ;;  %s1674_s20 = sld [smem:[#allocation2 + $0x4e]] }
  0xaf   : > { %2700 = sst [smem:[#allocation71_spill]] %s1650_s8  ;;  %s2752_s21 = sld [smem:[#allocation54_spill]] }
  0xb0   : > { %2703 = sst [smem:[#allocation91_spill]] %s1658_s3  ;;  %s2753_s18 = sld [smem:[#allocation55_spill]] }
  0xb1   : > { %2702 = sst [smem:[#allocation73_spill]] %s1656_s15  ;;  %s2754_s19 = sld [smem:[#allocation56_spill]] }
  0xb2   : > { %s2757_s24 = sld [smem:[#allocation57_spill]]  ;;  %s2759_s12 = sld [smem:[#allocation58_spill]] }
  0xb3   : > { %2707 = sst [smem:[#allocation75_spill]] %s1664_s5  ;;  %s2761_s25 = sld [smem:[#allocation60_spill]] }
  0xb4   : > { %2708 = sst [smem:[#allocation92_spill]] %s1666_s11  ;;  %s2760_s3 = sld [smem:[#allocation59_spill]] }
  0xb5   : > { %2714 = sst [smem:[#allocation93_spill]] %s1672_s16  ;;  %s2763_s22 = sld [smem:[#allocation62_spill]] }
  0xb6   : > { %2715 = sst [smem:[#allocation94_spill]] %s1674_s20  ;;  %s2762_s9 = sld [smem:[#allocation61_spill]] }
  0xb7   : > { %s2764_s17 = sld [smem:[#allocation63_spill]]  ;;  %s2766_s0 = sld [smem:[#allocation64_spill]] }
  0xb8   : > { %s2768_s23 = sld [smem:[#allocation65_spill]]  ;;  %s2770_s10 = sld [smem:[#allocation66_spill]] }
  0xb9   : > { %s2771_s11 = sld [smem:[#allocation67_spill]]  ;;  %s2772_s5 = sld [smem:[#allocation68_spill]] }
  0xba   : > { %s2773_s20 = sld [smem:[#allocation69_spill]]  ;;  %s2774_s16 = sld [smem:[#allocation46_spill]] }
  0xbb   : > { %s2777_s27 = sld [smem:[#allocation47_spill]]  ;;  %s2780_s28 = sld [smem:[#allocation48_spill]] }
  0xbc   : > { %s2782_s30 = sld [smem:[#allocation49_spill]]  ;;  %s2784_s6 = sld [smem:[#allocation50_spill]] }
  0xbd   : > { %s2790_s8 = sld [smem:[#allocation51_spill]]  ;;  %s2793_s26 = sld [smem:[#allocation52_spill]] }
  0xbe   : > { %s2799_s15 = sld [smem:[#allocation53_spill]] }
  0xdf   : > { %v245_v61 = vpop.trf.xlu1  ;;  %v210_v1 = vpop.trf.xlu0 }
  0xe0   : > { %v531_v7 = vmul.f32 %v245_v61, %v245_v61  ;;  %v331_v60 = vmul.f32 %v210_v1, %v210_v1  ;;  %v381_v6 = vmul.f32 %v245_v61, %v210_v1 }
  0xe2   : > { %v1704_v4 = vmul.f32 %v534_v8, %v531_v7  ;;  %v1710_v62 = vmul.f32 %v540_v9, %v531_v7  ;;  %v1714_v0 = vmul.f32 %v546_v10, %v531_v7  ;;  %v1718_v3 = vmul.f32 %v552_v11, %v531_v7 }
  0xe3   : > { %v1722_v59 = vmul.f32 %v558_v12, %v531_v7  ;;  %v1724_v5 = vpop.trf.xlu1  ;;  %v1726_v2 = vpop.trf.xlu0  ;;  %v335_v63 = vmul.f32 %v334_v16, %v331_v60  ;;  %v341_v58 = vmul.f32 %v340_v17, %v331_v60  ;;  %v347_v57 = vmul.f32 %v346_v18, %v331_v60 }
  0xe4   : > { %2737 = vst [vmem:[#allocation95_spill] sm:$0xff] %v1724_v5  ;;  %2739 = vst [vmem:[#allocation96_spill] sm:$0xff] %v1726_v2  ;;  %v353_v56 = vmul.f32 %v352_v19, %v331_v60  ;;  %v359_v39 = vmul.f32 %v358_v20, %v331_v60  ;;  %v365_v38 = vmul.f32 %v364_v21, %v331_v60 }
  0xe5   : > { %v371_v37 = vmul.f32 %v370_v22, %v331_v60  ;;  %v377_v36 = vmul.f32 %v376_v23, %v331_v60  ;;  %v385_v35 = vmul.f32 %v384_v24, %v381_v6  ;;  %v391_v34 = vmul.f32 %v390_v25, %v381_v6 }
  0xe6   : > { %v397_v33 = vmul.f32 %v396_v26, %v381_v6  ;;  %v403_v32 = vmul.f32 %v402_v27, %v381_v6  ;;  %v409_v55 = vmul.f32 %v408_v28, %v381_v6  ;;  %v415_v54 = vmul.f32 %v414_v29, %v381_v6 }
  0xe7   : > { %v421_v53 = vmul.f32 %v420_v30, %v381_v6  ;;  %v427_v52 = vmul.f32 %v426_v31, %v381_v6  ;;  %v1762_v51 = vmul.f32 %v564_v13, %v531_v7  ;;  %v1766_v60 = vmul.f32 %v570_v14, %v531_v7  ;;  %v315_v48 = vpop.trf.xlu1  ;;  %v280_v44 = vpop.trf.xlu0 }
  0xe8   : > { %v1770_v50 = vmul.f32 %v576_v15, %v531_v7  ;;  %v1772_v49 = vadd.f32 %v385_v35, %v335_v63  ;;  %v1774_v47 = vadd.f32 %v391_v34, %v341_v58  ;;  %v1776_v46 = vadd.f32 %v397_v33, %v347_v57 }
  0xe9   : > { %v1778_v45 = vadd.f32 %v403_v32, %v353_v56  ;;  %v1780_v6 = vadd.f32 %v409_v55, %v359_v39  ;;  %v1782_v43 = vadd.f32 %v415_v54, %v365_v38  ;;  %v1784_v7 = vadd.f32 %v421_v53, %v371_v37 }
  0xea   : > { %v532_v34 = vmul.f32 %v1724_v5, %v1724_v5  ;;  %v332_v32 = vmul.f32 %v1726_v2, %v1726_v2  ;;  %v1790_v33 = vadd.f32 %v427_v52, %v377_v36  ;;  %v382_v35 = vmul.f32 %v1724_v5, %v1726_v2 }
  0xeb   : > { %v1794_v38 = vmul.f32 %v315_v48, %v210_v1  ;;  %v631_v37 = vmul.f32 %v315_v48, %v245_v61  ;;  %v781_v53 = vmul.f32 %v315_v48, %v315_v48  ;;  %v1800_v54 = vmul.f32 %v280_v44, %v210_v1 }
  0xec   : > { %v1798_v39 = vmul.f32 %v534_v8, %v532_v34  ;;  %v1802_v36 = vmul.f32 %v280_v44, %v245_v61  ;;  %v1806_v52 = vmul.f32 %v540_v9, %v532_v34  ;;  %v1810_v55 = vmul.f32 %v546_v10, %v532_v34 }
  0xed   : > { %v1814_v8 = vmul.f32 %v552_v11, %v532_v34  ;;  %v1818_v56 = vmul.f32 %v558_v12, %v532_v34  ;;  %v1822_v57 = vmul.f32 %v564_v13, %v532_v34  ;;  %v1826_v9 = vmul.f32 %v570_v14, %v532_v34 }
  0xee   : > { %2744 = vst [vmem:[#allocation97_spill] sm:$0xff] %v1798_v39  ;;  %2745 = vst [vmem:[#allocation98_spill] sm:$0xff] %v1806_v52  ;;  %v1830_v10 = vmul.f32 %v576_v15, %v532_v34  ;;  %v336_v11 = vmul.f32 %v334_v16, %v332_v32  ;;  %v342_v58 = vmul.f32 %v340_v17, %v332_v32  ;;  %v2779_v1 = vstv %s2760_s3 }
  0xef   : > { %2746 = vst [vmem:[#allocation99_spill] sm:$0xff] %v1810_v55  ;;  %2747 = vst [vmem:[#allocation100_spill] sm:$0xff] %v1814_v8  ;;  %v348_v12 = vmul.f32 %v346_v18, %v332_v32  ;;  %v1840_v61 = vmul.f32 %v352_v19, %v332_v32  ;;  %v1844_v13 = vmul.f32 %v358_v20, %v332_v32  ;;  %v2794_v8 = vstv %s2772_s5 }
  0xf0   : > { %2748 = vst [vmem:[#allocation101_spill] sm:$0xff] %v1818_v56  ;;  %2749 = vst [vmem:[#allocation102_spill] sm:$0xff] %v1822_v57  ;;  %v1848_v14 = vmul.f32 %v364_v21, %v332_v32  ;;  %v1852_v15 = vmul.f32 %v370_v22, %v332_v32  ;;  %v1856_v16 = vmul.f32 %v376_v23, %v332_v32  ;;  %v2781_v32 = vstv %s2761_s25 }
  0xf1   : > { %2750 = vst [vmem:[#allocation103_spill] sm:$0xff] %v1826_v9  ;;  %2751 = vst [vmem:[#allocation104_spill] sm:$0xff] %v1830_v10  ;;  %v386_v17 = vmul.f32 %v384_v24, %v382_v35  ;;  %v392_v18 = vmul.f32 %v390_v25, %v382_v35  ;;  %v398_v19 = vmul.f32 %v396_v26, %v382_v35  ;;  %v2786_v10 = vstv %s2764_s17 }
  0xf2   : > { %2755 = vst [vmem:[#allocation105_spill] sm:$0xff] %v1848_v14  ;;  %2756 = vst [vmem:[#allocation106_spill] sm:$0xff] %v1852_v15  ;;  %v404_v20 = vmul.f32 %v402_v27, %v382_v35  ;;  %v410_v21 = vmul.f32 %v408_v28, %v382_v35  ;;  %v1870_v22 = vmul.f32 %v414_v29, %v382_v35  ;;  %v2787_v9 = vstv %s2766_s0 }
  0xf3   : > { %2758 = vst [vmem:[#allocation107_spill] sm:$0xff] %v1856_v16  ;;  %v1874_v23 = vmul.f32 %v420_v30, %v382_v35  ;;  %v1878_v24 = vmul.f32 %v426_v31, %v382_v35  ;;  %v1880_v25 = vmul.f32 %v280_v44, %v280_v44  ;;  %v1882_v26 = vmul.f32 %v315_v48, %v280_v44  ;;  %v1896_v30 = vpop.trf.xlu1 }
  0xf4   : > { %2765 = vst [vmem:[#allocation108_spill] sm:$0xff] %v1870_v22  ;;  %v1886_v27 = vmul.f32 %v2577_v40, %v631_v37  ;;  %v1890_v28 = vmul.f32 %v2576_v41, %v631_v37  ;;  %v1894_v29 = vmul.f32 %v2575_v42, %v631_v37  ;;  %2775 = vst [vmem:[#allocation111_spill] sm:$0xff] %v1896_v30  ;;  %v2776_v31 = vstv %s2757_s24 }
  0xf5   : > { %2767 = vst [vmem:[#allocation109_spill] sm:$0xff] %v1874_v23  ;;  %2769 = vst [vmem:[#allocation110_spill] sm:$0xff] %v1878_v24  ;;  %v1900_v63 = vmul.f32 %v2776_v31, %v631_v37  ;;  %v2778_v44 = vstv %s2759_s12  ;;  %v1908_v34 = vmul.f32 %v2779_v1, %v631_v37  ;;  %v1912_v35 = vmul.f32 %v2781_v32, %v631_v37 }
  0xf6   : > { %v1904_v48 = vmul.f32 %v2778_v44, %v631_v37  ;;  %v2783_v42 = vstv %s2762_s9  ;;  %v2785_v40 = vstv %s2763_s22  ;;  %v1924_v44 = vmul.f32 %v2786_v10, %v781_v53 }
  0xf7   : > { %v1916_v41 = vmul.f32 %v2783_v42, %v631_v37  ;;  %v1920_v31 = vmul.f32 %v2785_v40, %v781_v53  ;;  %v1928_v1 = vmul.f32 %v2787_v9, %v781_v53  ;;  %v2788_v57 = vstv %s2768_s23 }
  0xf8   : > { %v1932_v32 = vmul.f32 %v2788_v57, %v781_v53  ;;  %v2789_v56 = vstv %s2770_s10  ;;  %v2791_v37 = vstv %s2771_s11  ;;  %v482_v10 = vmul.f32 %v1896_v30, %v1726_v2 }
  0xf9   : > { %v1936_v42 = vmul.f32 %v2789_v56, %v781_v53  ;;  %v1940_v40 = vmul.f32 %v2791_v37, %v781_v53  ;;  %v1946_v55 = vmul.f32 %v2794_v8, %v781_v53  ;;  %v2796_v9 = vstv %s2773_s20 }
  0xfa   : > { %v1950_v52 = vmul.f32 %v2796_v9, %v781_v53  ;;  %v2798_v57 = vstv %s2774_s16  ;;  %v2800_v39 = vstv %s2777_s27  ;;  %v2803_v2 = vstv %s2780_s28  ;;  %s2887_s16 = sld [smem:[#allocation90_spill]]  ;;  %s2890_s27 = sld [smem:[#allocation70_spill]] }
  0xfb   : > { %2792 = vst [vmem:[#allocation112_spill] sm:$0xff] %v1940_v40  ;;  %2795 = vst [vmem:[#allocation113_spill] sm:$0xff] %v1946_v55  ;;  %v485_v56 = vmul.f32 %v2798_v57, %v1794_v38  ;;  %v491_v37 = vmul.f32 %v2800_v39, %v1794_v38  ;;  %v2801_v24 = vmov %v2798_v57  ;;  %v497_v8 = vmul.f32 %v2803_v2, %v1794_v38  ;;  %s2892_s28 = sld [smem:[#allocation71_spill]] }
  0xfc   : > { %2797 = vst [vmem:[#allocation114_spill] sm:$0xff] %v1950_v52  ;;  %v1960_v16 = vmul.f32 %v2801_v24, %v482_v10  ;;  %v2804_v23 = vstv %s2782_s30  ;;  %v2805_v53 = vstv %s2784_s6  ;;  %v2806_v52 = vmov %v2800_v39  ;;  %s2894_s30 = sld [smem:[#allocation73_spill]]  ;;  %s2896_s6 = sld [smem:[#allocation21_spill]] }
  0xfd   : > { %v503_v15 = vmul.f32 %v2804_v23, %v1794_v38  ;;  %v509_v9 = vmul.f32 %v2805_v53, %v1794_v38  ;;  %v1973_v22 = vmul.f32 %v2806_v52, %v482_v10  ;;  %v2808_v57 = vmov %v2803_v2 }
  0xfe   : > { %2802 = vst [vmem:[#allocation115_spill] sm:$0xff] %v1960_v16  ;;  %v1977_v14 = vmul.f32 %v2808_v57, %v482_v10  ;;  %v2810_v39 = vmov %v2804_v23  ;;  %v2812_v16 = vmov %v2805_v53  ;;  %v2814_v23 = vstv %s2790_s8  ;;  %s2898_s8 = sld [smem:[#allocation91_spill]] }
  0xff   : > { %2807 = vst [vmem:[#allocation116_spill] sm:$0xff] %v1973_v22  ;;  %v1981_v24 = vmul.f32 %v2810_v39, %v482_v10  ;;  %v1985_v2 = vmul.f32 %v2812_v16, %v482_v10  ;;  %v515_v55 = vmul.f32 %v2814_v23, %v1794_v38  ;;  %v2815_v53 = vmov %v2814_v23 }
 0x100   : > { %2809 = vst [vmem:[#allocation117_spill] sm:$0xff] %v1977_v14  ;;  %v1992_v52 = vmul.f32 %v2815_v53, %v482_v10  ;;  %v2817_v22 = vstv %s2793_s26  ;;  %v632_v39 = vmul.f32 %v1896_v30, %v1724_v5  ;;  %v2016_v5 = vadd.f32 %v386_v17, %v336_v11  ;;  %s2900_s26 = sld [smem:[#allocation75_spill]] }
 0x101   : > { %2811 = vst [vmem:[#allocation118_spill] sm:$0xff] %v1981_v24  ;;  %2813 = vst [vmem:[#allocation119_spill] sm:$0xff] %v1985_v2  ;;  %v521_v57 = vmul.f32 %v2817_v22, %v1794_v38  ;;  %v2818_v24 = vmov %v2817_v22  ;;  %v2820_v2 = vstv %s2799_s15  ;;  %v782_v22 = vmul.f32 %v1896_v30, %v1896_v30  ;;  %s2901_s15 = sld [smem:[#allocation92_spill]] }
 0x102   : > { %2816 = vst [vmem:[#allocation120_spill] sm:$0xff] %v1992_v52  ;;  %v2001_v16 = vmul.f32 %v2818_v24, %v482_v10  ;;  %v527_v23 = vmul.f32 %v2820_v2, %v1794_v38  ;;  %v2821_v14 = vmov %v2820_v2  ;;  %v2823_v52 = vstv %s2752_s21  ;;  %s2836_s21 = sld [smem:[#allocation72_spill]] }
 0x103   : > { %v2008_v53 = vmul.f32 %v2821_v14, %v482_v10  ;;  %v2014_v40 = vmul.f32 %v2823_v52, %v632_v39  ;;  %v2018_v24 = vadd.f32 %v392_v18, %v342_v58  ;;  %v2020_v38 = vadd.f32 %v398_v19, %v348_v12 }
 0x104   : > { %2819 = vst [vmem:[#allocation121_spill] sm:$0xff] %v2001_v16  ;;  %v2825_v2 = vstv %s2753_s18  ;;  %v2827_v10 = vstv %s2754_s19  ;;  %v2829_v16 = vstv %s2757_s24  ;;  %v2831_v52 = vstv %s2759_s12  ;;  %s2851_s18 = sld [smem:[#allocation74_spill]]  ;;  %s2865_s19 = sld [smem:[#allocation76_spill]] }
 0x105   : > { %2822 = vst [vmem:[#allocation122_spill] sm:$0xff] %v2008_v53  ;;  %2824 = vst [vmem:[#allocation123_spill] sm:$0xff] %v2014_v40  ;;  %v2024_v14 = vmul.f32 %v2825_v2, %v632_v39  ;;  %v2028_v53 = vmul.f32 %v2827_v10, %v632_v39  ;;  %v2032_v30 = vmul.f32 %v2829_v16, %v632_v39  ;;  %v2833_v17 = vstv %s2760_s3  ;;  %s2866_s24 = sld [smem:[#allocation77_spill]]  ;;  %s2867_s12 = sld [smem:[#allocation78_spill]] }
 0x106   : > { %v2036_v11 = vmul.f32 %v2831_v52, %v632_v39  ;;  %v2040_v58 = vmul.f32 %v2833_v17, %v632_v39  ;;  %v2835_v12 = vstv %s2761_s25  ;;  %v2838_v19 = vstv %s2762_s9  ;;  %s2868_s3 = sld [smem:[#allocation79_spill]]  ;;  %s2869_s25 = sld [smem:[#allocation80_spill]] }
 0x107   : > { %2826 = vst [vmem:[#allocation124_spill] sm:$0xff] %v2024_v14  ;;  %2828 = vst [vmem:[#allocation125_spill] sm:$0xff] %v2028_v53  ;;  %v2044_v18 = vmul.f32 %v2835_v12, %v632_v39  ;;  %v2048_v2 = vmul.f32 %v2838_v19, %v632_v39  ;;  %v2840_v10 = vstv %s2763_s22  ;;  %v2846_v17 = vstv %s2768_s23  ;;  %s2870_s9 = sld [smem:[#allocation81_spill]]  ;;  %s2871_s22 = sld [smem:[#allocation82_spill]] }
 0x108   : > { %2830 = vst [vmem:[#allocation126_spill] sm:$0xff] %v2032_v30  ;;  %2832 = vst [vmem:[#allocation127_spill] sm:$0xff] %v2036_v11  ;;  %v2052_v16 = vmul.f32 %v2840_v10, %v782_v22  ;;  %v2842_v30 = vstv %s2764_s17  ;;  %v2844_v11 = vstv %s2766_s0  ;;  %v2848_v12 = vstv %s2770_s10  ;;  %s2880_s17 = sld [smem:[#allocation83_spill]]  ;;  %s2881_s0 = sld [smem:[#allocation84_spill]] }
 0x109   : > { %2834 = vst [vmem:[#allocation128_spill] sm:$0xff] %v2040_v58  ;;  %2837 = vst [vmem:[#allocation129_spill] sm:$0xff] %v2044_v18  ;;  %v2056_v52 = vmul.f32 %v2842_v30, %v782_v22  ;;  %v2060_v53 = vmul.f32 %v2844_v11, %v782_v22  ;;  %v2064_v58 = vmul.f32 %v2846_v17, %v782_v22  ;;  %v2850_v14 = vstv %s2771_s11  ;;  %s2882_s23 = sld [smem:[#allocation85_spill]]  ;;  %s2883_s10 = sld [smem:[#allocation86_spill]] }
 0x10a   : > { %2839 = vst [vmem:[#allocation130_spill] sm:$0xff] %v2048_v2  ;;  %2841 = vst [vmem:[#allocation131_spill] sm:$0xff] %v2052_v16  ;;  %v2068_v18 = vmul.f32 %v2848_v12, %v782_v22  ;;  %v2072_v39 = vmul.f32 %v2850_v14, %v782_v22  ;;  %v2853_v19 = vstv %s2772_s5  ;;  %v2855_v16 = vstv %s2773_s20  ;;  %s2884_s11 = sld [smem:[#allocation87_spill]]  ;;  %s2885_s5 = sld [smem:[#allocation88_spill]] }
 0x10b   : > { %2843 = vst [vmem:[#allocation132_spill] sm:$0xff] %v2056_v52  ;;  %2845 = vst [vmem:[#allocation133_spill] sm:$0xff] %v2060_v53  ;;  %v2076_v10 = vmul.f32 %v2853_v19, %v782_v22  ;;  %v2080_v2 = vmul.f32 %v2855_v16, %v782_v22  ;;  %v2083_v30 = vadd.f32 %v404_v20, %v1840_v61  ;;  %v2857_v17 = vstv %s2697_s13  ;;  %s2886_s20 = sld [smem:[#allocation89_spill]] }
 0x10c   : > { %2847 = vst [vmem:[#allocation134_spill] sm:$0xff] %v2064_v58  ;;  %2849 = vst [vmem:[#allocation135_spill] sm:$0xff] %v2068_v18  ;;  %v2086_v11 = vadd.f32 %v410_v21, %v1844_v13  ;;  %v435_v12 = vmul.f32 %v2857_v17, %v1800_v54  ;;  %v2858_v18 = vstv %s1562_s4  ;;  %v2859_v14 = vstv %s2699_s2 }
 0x10d   : > { %2852 = vst [vmem:[#allocation136_spill] sm:$0xff] %v2072_v39  ;;  %2854 = vst [vmem:[#allocation137_spill] sm:$0xff] %v2076_v10  ;;  %v441_v58 = vmul.f32 %v2858_v18, %v1800_v54  ;;  %v447_v39 = vmul.f32 %v2859_v14, %v1800_v54  ;;  %v2860_v19 = vstv %s2836_s21  ;;  %v2861_v22 = vstv %s1568_s14 }
 0x10e   : > { %2856 = vst [vmem:[#allocation138_spill] sm:$0xff] %v2080_v2  ;;  %v453_v10 = vmul.f32 %v2860_v19, %v1800_v54  ;;  %v459_v16 = vmul.f32 %v2861_v22, %v1800_v54  ;;  %v2862_v61 = vstv %s2701_s1  ;;  %v2863_v13 = vstv %s1576_s7 }
 0x10f   : > { %v465_v20 = vmul.f32 %v2862_v61, %v1800_v54  ;;  %v471_v21 = vmul.f32 %v2863_v13, %v1800_v54  ;;  %v437_v17 = vadd.f32 %v435_v12, %v1772_v49  ;;  %v443_v2 = vadd.f32 %v441_v58, %v1774_v47 }
 0x110   : > { %v449_v18 = vadd.f32 %v447_v39, %v1776_v46  ;;  %v2864_v14 = vstv %s2851_s18  ;;  %v455_v19 = vadd.f32 %v453_v10, %v1778_v45  ;;  %v461_v52 = vadd.f32 %v459_v16, %v1780_v6 }
 0x111   : > { %v477_v53 = vmul.f32 %v2864_v14, %v1800_v54  ;;  %v467_v22 = vadd.f32 %v465_v20, %v1782_v43  ;;  %v473_v61 = vadd.f32 %v471_v21, %v1784_v7  ;;  %v487_v13 = vadd.f32 %v485_v56, %v437_v17 }
 0x112   : > { %v493_v49 = vadd.f32 %v491_v37, %v443_v2  ;;  %v499_v47 = vadd.f32 %v497_v8, %v449_v18  ;;  %v505_v46 = vadd.f32 %v503_v15, %v455_v19  ;;  %v511_v58 = vadd.f32 %v509_v9, %v461_v52 }
 0x113   : > { %v479_v40 = vadd.f32 %v477_v53, %v1790_v33  ;;  %v517_v54 = vadd.f32 %v515_v55, %v467_v22  ;;  %v523_v45 = vadd.f32 %v521_v57, %v473_v61  ;;  %v537_v43 = vadd.f32 %v1704_v4, %v487_v13 }
 0x114   : > { %v543_v7 = vadd.f32 %v1710_v62, %v493_v49  ;;  %v549_v33 = vadd.f32 %v1714_v0, %v499_v47  ;;  %v555_v56 = vadd.f32 %v1718_v3, %v505_v46  ;;  %v561_v37 = vadd.f32 %v1722_v59, %v511_v58 }
 0x115   : > { %v529_v6 = vadd.f32 %v527_v23, %v479_v40  ;;  %v567_v15 = vadd.f32 %v1762_v51, %v517_v54  ;;  %v573_v8 = vadd.f32 %v1766_v60, %v523_v45  ;;  %v2872_v9 = vstv %s2704_s29 }
 0x116   : > { %v585_v40 = vmul.f32 %v2872_v9, %v1802_v36  ;;  %v2873_v4 = vstv %s2865_s19  ;;  %v2874_v62 = vstv %s2866_s24  ;;  %v2875_v23 = vstv %s2867_s12 }
 0x117   : > { %v579_v55 = vadd.f32 %v1770_v50, %v529_v6  ;;  %v591_v57 = vmul.f32 %v2873_v4, %v1802_v36  ;;  %v597_v0 = vmul.f32 %v2874_v62, %v1802_v36  ;;  %v603_v3 = vmul.f32 %v2875_v23, %v1802_v36 }
 0x118   : > { %v2876_v59 = vstv %s2868_s3  ;;  %v2877_v51 = vstv %s2869_s25  ;;  %v2878_v50 = vstv %s2870_s9  ;;  %v587_v52 = vadd.f32 %v585_v40, %v537_v43 }
 0x119   : > { %v609_v53 = vmul.f32 %v2876_v59, %v1802_v36  ;;  %v615_v60 = vmul.f32 %v2877_v51, %v1802_v36  ;;  %v621_v2 = vmul.f32 %v2878_v50, %v1802_v36  ;;  %v593_v39 = vadd.f32 %v591_v57, %v543_v7 }
 0x11a   : > { %v599_v10 = vadd.f32 %v597_v0, %v549_v33  ;;  %v2879_v12 = vstv %s2871_s22  ;;  %v605_v20 = vadd.f32 %v603_v3, %v555_v56  ;;  %v637_v19 = vadd.f32 %v1886_v27, %v587_v52 }
 0x11b   : > { %v627_v16 = vmul.f32 %v2879_v12, %v1802_v36  ;;  %v611_v21 = vadd.f32 %v609_v53, %v561_v37  ;;  %v617_v17 = vadd.f32 %v615_v60, %v567_v15  ;;  %v623_v18 = vadd.f32 %v621_v2, %v573_v8 }
 0x11c   : > { %v643_v22 = vadd.f32 %v1890_v28, %v593_v39  ;;  %v649_v61 = vadd.f32 %v1894_v29, %v599_v10  ;;  %v655_v13 = vadd.f32 %v1900_v63, %v605_v20  ;;  %v2888_v58 = vstv %s2880_s17 }
 0x11d   : > { %v629_v14 = vadd.f32 %v627_v16, %v579_v55  ;;  %v661_v36 = vadd.f32 %v1904_v48, %v611_v21  ;;  %v667_v49 = vadd.f32 %v1908_v34, %v617_v17  ;;  %v673_v47 = vadd.f32 %v1912_v35, %v623_v18 }
 0x11e   : > { %v685_v54 = vmul.f32 %v2888_v58, %v1880_v25  ;;  %v2889_v27 = vstv %s2881_s0  ;;  %v2891_v29 = vstv %s2882_s23  ;;  %v2893_v48 = vstv %s2883_s10  ;;  %s2902_s23 = sld [smem:[#allocation93_spill]] }
 0x11f   : > { %v679_v46 = vadd.f32 %v1916_v41, %v629_v14  ;;  %v691_v28 = vmul.f32 %v2889_v27, %v1880_v25  ;;  %v697_v63 = vmul.f32 %v2891_v29, %v1880_v25  ;;  %v703_v34 = vmul.f32 %v2893_v48, %v1880_v25  ;;  %v2915_v29 = vld [vmem:[#allocation105_spill] sm:$0xff] }
 0x120   : > { %v2895_v35 = vstv %s2884_s11  ;;  %v2897_v41 = vstv %s2885_s5  ;;  %v2899_v43 = vstv %s2886_s20  ;;  %v687_v33 = vadd.f32 %v685_v54, %v637_v19  ;;  %s2904_s11 = sld [smem:[#allocation94_spill]]  ;;  %s980_s20 = sshll.u32 %s2896_s6, 7  ;;  %v2913_v54 = vld [vmem:[#allocation112_spill] sm:$0xff] }
 0x121   : > { %v709_v45 = vmul.f32 %v2895_v35, %v1880_v25  ;;  %v715_v6 = vmul.f32 %v2897_v41, %v1880_v25  ;;  %v721_v7 = vmul.f32 %v2899_v43, %v1880_v25  ;;  %v693_v56 = vadd.f32 %v691_v28, %v643_v22  ;;  %v2914_v28 = vld [vmem:[#allocation113_spill] sm:$0xff]  ;;  %v2920_v41 = vld [vmem:[#allocation96_spill] sm:$0xff]  ;;  %s2222_s6 = scalar_lea.vmem [#allocation7], %s980_s20  ;;  %v2923_v43 = vld [vmem:[#allocation95_spill] sm:$0xff] }
 0x122   : > { %v699_v37 = vadd.f32 %v697_v63, %v649_v61  ;;  %v2903_v15 = vstv %s2887_s16  ;;  %v705_v55 = vadd.f32 %v703_v34, %v655_v13  ;;  %v2905_v62 = vstv %s2890_s27  ;;  %v281_v61 = vpop.trf.xlu0  ;;  %v2916_v63 = vld [vmem:[#allocation108_spill] sm:$0xff]  ;;  %v2917_v34 = vld [vmem:[#allocation106_spill] sm:$0xff]  ;;  %v2918_v35 = vld [vmem:[#allocation109_spill] sm:$0xff] }
 0x123   : > { %v727_v8 = vmul.f32 %v2903_v15, %v1880_v25  ;;  %v711_v9 = vadd.f32 %v709_v45, %v661_v36  ;;  %v717_v40 = vadd.f32 %v715_v6, %v667_v49  ;;  %v723_v4 = vadd.f32 %v721_v7, %v673_v47 }
 0x124   : > { %v735_v0 = vmul.f32 %v2905_v62, %v1882_v26  ;;  %v2906_v23 = vstv %s2892_s28  ;;  %v2907_v59 = vstv %s2894_s30  ;;  %v2908_v51 = vstv %s2898_s8 }
 0x125   : > { %v729_v57 = vadd.f32 %v727_v8, %v679_v46  ;;  %v741_v3 = vmul.f32 %v2906_v23, %v1882_v26  ;;  %v747_v53 = vmul.f32 %v2907_v59, %v1882_v26  ;;  %v753_v60 = vmul.f32 %v2908_v51, %v1882_v26 }
 0x126   : > { %v2909_v25 = vstv %s2900_s26  ;;  %v2910_v2 = vstv %s2901_s15  ;;  %v2911_v39 = vstv %s2902_s23  ;;  %v737_v12 = vadd.f32 %v735_v0, %v687_v33 }
 0x127   : > { %v759_v50 = vmul.f32 %v2909_v25, %v1882_v26  ;;  %v765_v52 = vmul.f32 %v2910_v2, %v1882_v26  ;;  %v771_v10 = vmul.f32 %v2911_v39, %v1882_v26  ;;  %v743_v16 = vadd.f32 %v741_v3, %v693_v56  ;;  %v2924_v56 = vld [vmem:[#allocation111_spill] sm:$0xff] }
 0x128   : > { %v749_v20 = vadd.f32 %v747_v53, %v699_v37  ;;  %v2912_v21 = vstv %s2904_s11  ;;  %v755_v18 = vadd.f32 %v753_v60, %v705_v55  ;;  %v787_v36 = vadd.f32 %v1920_v31, %v737_v12  ;;  %v2919_v31 = vld [vmem:[#allocation114_spill] sm:$0xff] }
 0x129   : > { %v777_v17 = vmul.f32 %v2912_v21, %v1882_v26  ;;  %v761_v14 = vadd.f32 %v759_v50, %v711_v9  ;;  %v767_v19 = vadd.f32 %v765_v52, %v717_v40  ;;  %v773_v22 = vadd.f32 %v771_v10, %v723_v4  ;;  %v2933_v21 = vld [vmem:[#allocation115_spill] sm:$0xff] }
 0x12a   : > { %v793_v49 = vadd.f32 %v1924_v44, %v743_v16  ;;  %v799_v47 = vadd.f32 %v1928_v1, %v749_v20  ;;  %v805_v46 = vadd.f32 %v1932_v32, %v755_v18  ;;  %v418_v48 = vadd.f32 %v2916_v63, %v2915_v29  ;;  %832 = vst.msk [vmem:[%s2222_s6] sm:$0xff] %vm831_vm0, %v787_v36  ;;  %v2921_v32 = vld [vmem:[#allocation107_spill] sm:$0xff]  ;;  %v2934_v18 = vld [vmem:[#allocation116_spill] sm:$0xff] }
 0x12b   : > { %v779_v13 = vadd.f32 %v777_v17, %v729_v57  ;;  %v811_v58 = vadd.f32 %v1936_v42, %v761_v14  ;;  %v817_v27 = vadd.f32 %v2913_v54, %v767_v19  ;;  %v823_v26 = vadd.f32 %v2914_v28, %v773_v22  ;;  %v2922_v42 = vld [vmem:[#allocation110_spill] sm:$0xff]  ;;  %v2935_v19 = vld [vmem:[#allocation117_spill] sm:$0xff]  ;;  %v2943_v28 = vld [vmem:[#allocation99_spill] sm:$0xff] }
 0x12c   : > { %v424_v45 = vadd.f32 %v2918_v35, %v2917_v34  ;;  %v432_v1 = vmul.f32 %v281_v61, %v2920_v41  ;;  %1066 = vst.msk [vmem:[%s2222_s6 + $0x10] sm:$0xff] %vm831_vm0, %v793_v49  ;;  %1068 = vst.msk [vmem:[%s2222_s6 + $0x20] sm:$0xff] %vm831_vm0, %v799_v47  ;;  %v430_v6 = vadd.f32 %v2922_v42, %v2921_v32  ;;  %v2925_v15 = vstv %s2697_s13  ;;  %v2940_v49 = vld [vmem:[#allocation122_spill] sm:$0xff]  ;;  %v2944_v29 = vld [vmem:[#allocation100_spill] sm:$0xff]  ;;  %s2959_s13 = sld [smem:[#allocation89_spill]] }
 0x12d   : > { %v829_v44 = vadd.f32 %v2919_v31, %v779_v13  ;;  %v582_v7 = vmul.f32 %v281_v61, %v2923_v43  ;;  %v2233_v33 = vmul.f32 %v281_v61, %v281_v61  ;;  %v2236_v37 = vmul.f32 %v2924_v56, %v281_v61  ;;  %1070 = vst.msk [vmem:[%s2222_s6 + $0x30] sm:$0xff] %vm831_vm0, %v805_v46  ;;  %v2937_v61 = vld [vmem:[#allocation119_spill] sm:$0xff]  ;;  %v2939_v13 = vld [vmem:[#allocation121_spill] sm:$0xff]  ;;  %v2942_v54 = vld [vmem:[#allocation98_spill] sm:$0xff] }
 0x12e   : > { %1072 = vst.msk [vmem:[%s2222_s6 + $0x40] sm:$0xff] %vm831_vm0, %v811_v58  ;;  %1074 = vst.msk [vmem:[%s2222_s6 + $0x50] sm:$0xff] %vm831_vm0, %v817_v27  ;;  %v436_v8 = vmul.f32 %v2925_v15, %v432_v1  ;;  %v2926_v55 = vstv %s1562_s4  ;;  %v2927_v40 = vstv %s2699_s2  ;;  %v2941_v46 = vld [vmem:[#allocation97_spill] sm:$0xff]  ;;  %v2946_v35 = vld [vmem:[#allocation102_spill] sm:$0xff]  ;;  %s2958_s2 = sld [smem:[#allocation87_spill]] }
 0x12f   : > { %1076 = vst.msk [vmem:[%s2222_s6 + $0x60] sm:$0xff] %vm831_vm0, %v823_v26  ;;  %v442_v9 = vmul.f32 %v2926_v55, %v432_v1  ;;  %v448_v4 = vmul.f32 %v2927_v40, %v432_v1  ;;  %v2928_v57 = vstv %s2836_s21  ;;  %1078 = vst.msk [vmem:[%s2222_s6 + $0x70] sm:$0xff] %vm831_vm0, %v829_v44  ;;  %v2929_v0 = vstv %s1568_s14  ;;  %v2947_v31 = vld [vmem:[#allocation103_spill] sm:$0xff]  ;;  %v2948_v41 = vld [vmem:[#allocation104_spill] sm:$0xff]  ;;  %s2976_s14 = sld [smem:[#allocation14_spill]] }
 0x130   : > { %v454_v62 = vmul.f32 %v2928_v57, %v432_v1  ;;  %v460_v23 = vmul.f32 %v2929_v0, %v432_v1  ;;  %v2930_v3 = vstv %s2701_s1  ;;  %v2931_v53 = vstv %s1576_s7  ;;  %s2957_s1 = sld [smem:[#allocation85_spill]]  ;;  %s871_s7 = sshll.u32 %s2222_s6, 4  ;;  %s2368_s7 = int_to_ptr.vmem [resolvable:$true] %s871_s7 }
 0x131   : > { %v466_v59 = vmul.f32 %v2930_v3, %v432_v1  ;;  %v472_v51 = vmul.f32 %v2931_v53, %v432_v1  ;;  %v2932_v60 = vstv %s2851_s18  ;;  %v438_v50 = vadd.f32 %v436_v8, %v2016_v5  ;;  %v2936_v5 = vld [vmem:[#allocation118_spill] sm:$0xff] }
 0x132   : > { %v478_v25 = vmul.f32 %v2932_v60, %v432_v1  ;;  %v444_v2 = vadd.f32 %v442_v9, %v2018_v24  ;;  %v450_v52 = vadd.f32 %v448_v4, %v2020_v38  ;;  %v456_v39 = vadd.f32 %v454_v62, %v2083_v30  ;;  %v2938_v30 = vld [vmem:[#allocation120_spill] sm:$0xff] }
 0x133   : > { %v462_v10 = vadd.f32 %v460_v23, %v2086_v11  ;;  %v468_v12 = vadd.f32 %v466_v59, %v418_v48  ;;  %v474_v16 = vadd.f32 %v472_v51, %v424_v45  ;;  %v488_v17 = vadd.f32 %v2933_v21, %v438_v50  ;;  %v2945_v48 = vld [vmem:[#allocation101_spill] sm:$0xff]  ;;  %v2963_v21 = vld [vmem:[#allocation126_spill] sm:$0xff] }
 0x134   : > { %v480_v20 = vadd.f32 %v478_v25, %v430_v6  ;;  %v494_v14 = vadd.f32 %v2934_v18, %v444_v2  ;;  %v500_v22 = vadd.f32 %v2935_v19, %v450_v52  ;;  %v506_v24 = vadd.f32 %v2936_v5, %v456_v39  ;;  %v2960_v39 = vld [vmem:[#allocation123_spill] sm:$0xff]  ;;  %v2965_v19 = vld [vmem:[#allocation128_spill] sm:$0xff]  ;;  %v2966_v5 = vld [vmem:[#allocation129_spill] sm:$0xff] }
 0x135   : > { %v512_v38 = vadd.f32 %v2937_v61, %v462_v10  ;;  %v518_v11 = vadd.f32 %v2938_v30, %v468_v12  ;;  %v524_v36 = vadd.f32 %v2939_v13, %v474_v16  ;;  %v538_v58 = vadd.f32 %v2941_v46, %v488_v17  ;;  %v2961_v12 = vld [vmem:[#allocation124_spill] sm:$0xff]  ;;  %v2962_v16 = vld [vmem:[#allocation125_spill] sm:$0xff]  ;;  %v2964_v18 = vld [vmem:[#allocation127_spill] sm:$0xff]  ;;  %s1086_s4 = sshll.u32 %s2976_s14, 11 }
 0x136   : > { %v530_v47 = vadd.f32 %v2940_v49, %v480_v20  ;;  %v544_v27 = vadd.f32 %v2942_v54, %v494_v14  ;;  %v550_v26 = vadd.f32 %v2943_v28, %v500_v22  ;;  %v556_v63 = vadd.f32 %v2944_v29, %v506_v24  ;;  %v2967_v61 = vld [vmem:[#allocation130_spill] sm:$0xff] }
 0x137   : > { %v562_v34 = vadd.f32 %v2945_v48, %v512_v38  ;;  %v568_v45 = vadd.f32 %v2946_v35, %v518_v11  ;;  %v574_v44 = vadd.f32 %v2947_v31, %v524_v36  ;;  %v2949_v32 = vstv %s2704_s29  ;;  %s2989_s29 = sld [smem:[#allocation21_spill]] }
 0x138   : > { %v580_v1 = vadd.f32 %v2948_v41, %v530_v47  ;;  %v586_v42 = vmul.f32 %v2949_v32, %v582_v7  ;;  %v2950_v6 = vstv %s2865_s19  ;;  %v2951_v56 = vstv %s2866_s24  ;;  %s2990_s19 = sld [smem:[#allocation141_spill]] }
 0x139   : > { %v592_v43 = vmul.f32 %v2950_v6, %v582_v7  ;;  %v598_v15 = vmul.f32 %v2951_v56, %v582_v7  ;;  %v2952_v8 = vstv %s2867_s12  ;;  %v2953_v9 = vstv %s2868_s3  ;;  %s2992_s12 = sld [smem:[#allocation17_spill]] }
 0x13a   : > { %v604_v55 = vmul.f32 %v2952_v8, %v582_v7  ;;  %v610_v40 = vmul.f32 %v2953_v9, %v582_v7  ;;  %v2954_v4 = vstv %s2869_s25  ;;  %v2955_v62 = vstv %s2870_s9  ;;  %s1208_s25 = scalar_lea.vmem %s2368_s7, 2048  ;;  %s1300_s9 = smov [#allocation7]  }
 0x13b   : > { %v616_v57 = vmul.f32 %v2954_v4, %v582_v7  ;;  %v622_v0 = vmul.f32 %v2955_v62, %v582_v7  ;;  %v2956_v23 = vstv %s2871_s22  ;;  %v588_v59 = vadd.f32 %v586_v42, %v538_v58  ;;  %p1209_p8 = scmp.ne.s32.totalorder %s2368_s7, %s1208_s25  ;;  %s1212_s22 = sshll.u32 %s1300_s9, 4  ;;  %s1213_s22 = int_to_ptr.vmem [resolvable:$false] %s1212_s22 }
 0x13c   : > { %v628_v3 = vmul.f32 %v2956_v23, %v582_v7  ;;  %v594_v53 = vadd.f32 %v592_v43, %v544_v27  ;;  %v600_v51 = vadd.f32 %v598_v15, %v550_v26  ;;  %v606_v60 = vadd.f32 %v604_v55, %v556_v63  ;;  %p1215_p6 = scmp.lt.s32.totalorder %s2368_s7, %s1213_s22 }
 0x13d   : > { %v612_v25 = vadd.f32 %v610_v40, %v562_v34  ;;  %v618_v50 = vadd.f32 %v616_v57, %v568_v45  ;;  %v624_v2 = vadd.f32 %v622_v0, %v574_v44  ;;  %v638_v10 = vadd.f32 %v2960_v39, %v588_v59  ;;  %s856_s3 = scalar_lea.sflag [#allocation4], %s2989_s29 }
 0x13e   : > { %v630_v52 = vadd.f32 %v628_v3, %v580_v1  ;;  %v644_v7 = vadd.f32 %v2961_v12, %v594_v53  ;;  %v650_v20 = vadd.f32 %v2962_v16, %v600_v51  ;;  %v656_v17 = vadd.f32 %v2963_v21, %v606_v60  ;;  %v2987_v16 = vld [vmem:[#allocation133_spill] sm:$0xff]  ;;  %v2988_v21 = vld [vmem:[#allocation134_spill] sm:$0xff]  ;;  %s2366_s24 = scalar_lea.hbm %s2990_s19, %s1086_s4 }
 0x13f   : > { %v662_v14 = vadd.f32 %v2964_v18, %v612_v25  ;;  %v668_v22 = vadd.f32 %v2965_v19, %v618_v50  ;;  %v674_v24 = vadd.f32 %v2966_v5, %v624_v2  ;;  %v2968_v30 = vstv %s2880_s17  ;;  %v2991_v18 = vld [vmem:[#allocation135_spill] sm:$0xff]  ;;  %v2993_v19 = vld [vmem:[#allocation136_spill] sm:$0xff]  ;;  %v2994_v5 = vld [vmem:[#allocation137_spill] sm:$0xff]  ;;  %p2996_p13 = scmp.ne.s32.totalorder %s2992_s12, 0  ;;  %s1214_s17 = scalar_lea.vmem %s1213_s22, 4096 }
 0x140   : > { %v680_v38 = vadd.f32 %v2967_v61, %v630_v52  ;;  %v686_v11 = vmul.f32 %v2968_v30, %v2233_v33  ;;  %v2969_v13 = vstv %s2881_s0  ;;  %v2970_v49 = vstv %s2957_s1  ;;  %v2995_v61 = vld [vmem:[#allocation138_spill] sm:$0xff]  ;;  %p1216_p1 = scmp.lt.s32.totalorder %s1214_s17, %s1208_s25 }
 0x141   : > { %v692_v36 = vmul.f32 %v2969_v13, %v2233_v33  ;;  %v698_v47 = vmul.f32 %v2970_v49, %v2233_v33  ;;  %v2971_v46 = vstv %s2883_s10  ;;  %v2972_v54 = vstv %s2958_s2  ;;  %p1210_p0 = pnand %p1209_p8, %p2996_p13 }
 0x142   : > { %v704_v58 = vmul.f32 %v2971_v46, %v2233_v33  ;;  %v710_v27 = vmul.f32 %v2972_v54, %v2233_v33  ;;  %v2973_v28 = vstv %s2885_s5  ;;  %v2974_v29 = vstv %s2959_s13  ;;  %p1217_p7 = por %p1216_p1, %p1215_p6 }
 0x143   : > { %v716_v26 = vmul.f32 %v2973_v28, %v2233_v33  ;;  %v722_v63 = vmul.f32 %v2974_v29, %v2233_v33  ;;  %v2975_v48 = vstv %s2887_s16  ;;  %v688_v35 = vadd.f32 %v686_v11, %v638_v10  ;;  %v2985_v10 = vld [vmem:[#allocation131_spill] sm:$0xff]  ;;  %p1211_p2 = pneg %p1210_p0 }
 0x144   : > { %v728_v34 = vmul.f32 %v2975_v48, %v2233_v33  ;;  %v694_v45 = vadd.f32 %v692_v36, %v644_v7  ;;  %v700_v31 = vadd.f32 %v698_v47, %v650_v20  ;;  %v706_v44 = vadd.f32 %v704_v58, %v656_v17  ;;  %v2986_v7 = vld [vmem:[#allocation132_spill] sm:$0xff] }
 0x145   : > { %v712_v41 = vadd.f32 %v710_v27, %v662_v14  ;;  %v718_v1 = vadd.f32 %v716_v26, %v668_v22  ;;  %v724_v32 = vadd.f32 %v722_v63, %v674_v24  ;;  %v2977_v6 = vstv %s2890_s27  ;;  %p1218_p12 = pnand %p1217_p7, %p1211_p2 }
 0x146   : > { %v730_v42 = vadd.f32 %v728_v34, %v680_v38  ;;  %v736_v43 = vmul.f32 %v2977_v6, %v2236_v37  ;;  %v2978_v56 = vstv %s2892_s28  ;;  %v2979_v8 = vstv %s2894_s30 }
 0x147   : > { %v742_v15 = vmul.f32 %v2978_v56, %v2236_v37  ;;  %v748_v33 = vmul.f32 %v2979_v8, %v2236_v37  ;;  %v2980_v55 = vstv %s2898_s8  ;;  %v2981_v40 = vstv %s2900_s26 }
 0x148   : > { %v754_v9 = vmul.f32 %v2980_v55, %v2236_v37  ;;  %v760_v4 = vmul.f32 %v2981_v40, %v2236_v37  ;;  %v2982_v57 = vstv %s2901_s15  ;;  %v2983_v0 = vstv %s2902_s23 }
 0x149   : > { %v766_v62 = vmul.f32 %v2982_v57, %v2236_v37  ;;  %v772_v23 = vmul.f32 %v2983_v0, %v2236_v37  ;;  %v2984_v3 = vstv %s2904_s11  ;;  %v738_v53 = vadd.f32 %v736_v43, %v688_v35 }
 0x14a   : > { %v778_v59 = vmul.f32 %v2984_v3, %v2236_v37  ;;  %v744_v51 = vadd.f32 %v742_v15, %v694_v45  ;;  %v750_v60 = vadd.f32 %v748_v33, %v700_v31  ;;  %v756_v25 = vadd.f32 %v754_v9, %v706_v44 }
 0x14b   : > { %v762_v50 = vadd.f32 %v760_v4, %v712_v41  ;;  %v768_v2 = vadd.f32 %v766_v62, %v718_v1  ;;  %v774_v52 = vadd.f32 %v772_v23, %v724_v32  ;;  %v788_v12 = vadd.f32 %v2985_v10, %v738_v53 }
 0x14c   : > { %v780_v39 = vadd.f32 %v778_v59, %v730_v42  ;;  %v794_v37 = vadd.f32 %v2986_v7, %v744_v51  ;;  %v800_v20 = vadd.f32 %v2987_v16, %v750_v60  ;;  %v806_v17 = vadd.f32 %v2988_v21, %v756_v25 }
 0x14d   : > { %v812_v14 = vadd.f32 %v2991_v18, %v762_v50  ;;  %v818_v22 = vadd.f32 %v2993_v19, %v768_v2  ;;  %v824_v24 = vadd.f32 %v2994_v5, %v774_v52  ;;  %833 = vst.msk [vmem:[%s2222_s6 + $0x8] sm:$0xff] %vm831_vm0, %v788_v12 }
 0x14e   : > { %v830_v38 = vadd.f32 %v2995_v61, %v780_v39  ;;  %1067 = vst.msk [vmem:[%s2222_s6 + $0x18] sm:$0xff] %vm831_vm0, %v794_v37  ;;  %1069 = vst.msk [vmem:[%s2222_s6 + $0x28] sm:$0xff] %vm831_vm0, %v800_v20 }
 0x14f   : > { %1071 = vst.msk [vmem:[%s2222_s6 + $0x38] sm:$0xff] %vm831_vm0, %v806_v17  ;;  %1073 = vst.msk [vmem:[%s2222_s6 + $0x48] sm:$0xff] %vm831_vm0, %v812_v14 }
 0x150   : > { %1075 = vst.msk [vmem:[%s2222_s6 + $0x58] sm:$0xff] %vm831_vm0, %v818_v22  ;;  %1077 = vst.msk [vmem:[%s2222_s6 + $0x68] sm:$0xff] %vm831_vm0, %v824_v24 }
 0x151   : > { %1079 = vst.msk [vmem:[%s2222_s6 + $0x78] sm:$0xff] %vm831_vm0, %v830_v38 }
 0x152   : > { %1221 = shalt.err (!%p1218_p12)
}
 0x153   : > { %s1222_s0 = scalar_lea.hbm %s2366_s24, 2048  ;;  %s1226_s11 = scalar_lea.hbm %s2990_s19, 4096 }
 0x154   : > { %p1223_p4 = scmp.ne.s32.totalorder %s2366_s24, %s1222_s0  ;;  %p1227_p5 = scmp.lt.u32.totalorder %s2366_s24, %s2990_s19 }
 0x155   : > { %p1228_p9 = scmp.lt.u32.totalorder %s1226_s11, %s1222_s0  ;;  %p1230_p8 = scmp.lt.u32.totalorder %s1222_s0, %s2366_s24 }
 0x156   : > { %p1224_p10 = pnand %p1223_p4, %p2996_p13 }
 0x157   : > { %p1229_p3 = por %p1228_p9, %p1227_p5 }
 0x158   : > { %p1225_p11 = pneg %p1224_p10 }
 0x159   : > { %p1231_p0 = por %p1230_p8, %p1229_p3 }
 0x15b   : > { %p1232_p2 = pnand %p1231_p0, %p1225_p11 }
 0x15d   : > { %1235 = shalt.err (!%p1232_p2)
}
 0x15e   : > { %s1301_s16 = smov 128   ;;  %s1302_s27 = smov 8  }
 0x15f   : > { %1093 = dma.vmem_to_hbm [thread:$0]  (%p2996_p13), %s2368_s7, 2048, %s2366_s24, %s856_s3, %s1301_s16, %s1301_s16, %s1302_s27  }
 0x160 PF: > { %s2997_s28 = sld [smem:[#allocation11_spill]]  ;;  %s2998_s30 = sld [smem:[#allocation18_spill]] }
 0x161   : > { %s2999_s6 = sld [smem:[#allocation16_spill]] }
 0x166   : > { %s886_s8 = sand.u32 1, %s2997_s28   ;;  %p3000_p6 = scmp.ne.s32.totalorder %s2998_s30, 0 }
 0x167   : > { %p3001_p1 = scmp.ge.s32.totalorder %s2999_s6, 2  ;;  %s887_s26 = scalar_lea.sflag [#allocation4], %s886_s8 }
 0x169   : > { %p1104_p7 = pnand %p3001_p1, %p3000_p6 }
 0x16b   : > { %1269 = dma.done.wait (!%p1104_p7), %s887_s26, 2048  }
 0x16c   : > { %1271 = vsyncadd (!%p1104_p7), %s887_s26, 4294965248  ;;  %s19_s14 = sadd.s32 1, %s2999_s6   ;;  %s3002_s9 = sld [smem:[#allocation12_spill]] }
 0x16d   : > { %p16_p12 = scmp.ge.s32.totalorder %s19_s14, 4   ;;  %s3003_s10 = sld [smem:[#allocation13_spill]] }
 0x16e   : > { %s3004_s11 = sld [smem:[#allocation20_spill]]  ;;  %s3005_s12 = sld [smem:[#allocation15_spill]] }
 0x16f   : > { %s3006_s13 = sld [smem:[#allocation19_spill]]  ;;  %18 = sbr.rel (!%p16_p12) target bundleno = 11 (0xb), region = 88 }
 0x176   :  { %892 = vsyncpa [#allocation3], 1 }
 0x177   :  { %894 = vsyncpa [#allocation3 + $0x1], 1 }
 0x178   :  { %895 = vsyncpa [#allocation4], 1 }
 0x179   :  { %897 = vsyncpa [#allocation4 + $0x1], 1 }
 0x17a   :  { %898 = vsyncpa [#allocation5], 1 }
 0x17b   :  { %900 = vsyncpa [#allocation5 + $0x1], 1 }

</bundles_post_ra>
